<compile_context>
chip_gen: v7x
topology: tpu7x:2x2x1
jax: 0.10.0
libtpu: 0.0.40
codegen_flags: <defaults>
</compile_context>

<pallas_src>
import jax
import jax.numpy as jnp
from jax.experimental import pallas as pl
from jax.experimental.pallas import tpu as pltpu


EMBED_DIM = 768    # 'bert' -> 768 in the MODELS table
HIDDEN_DIM = 256   # GaussianNetwork hidden width (assumed)
LATENT_DIM = 32    # default latent_dim of the module
OUT_LANES = 128    # lane-dense slab: [z | mean | std | pad]
STD_EPS = 1e-4


def _gaussian_kernel(x_ref, w1_ref, b1_ref, wh_ref, bh_ref, noise_ref, out_ref):
    """One batch tile: relu MLP -> lane-packed heads -> reparameterized sample.

    wh/bh are packed to OUT_LANES lanes as [Wm | Wm | Ws | 0], so the head matmul
    already produces the lane-dense (tm, 128) slab; std is formed in place with a
    lane mask and z with a single lane rotation + FMA.  MXU matmuls run in bf16 with
    f32 accumulation; every elementwise op stays f32 (v5e-safe).
    """
    tm = x_ref.shape[0]
    L = LATENT_DIM

    x = x_ref[...].astype(jnp.bfloat16)
    h = jnp.dot(x, w1_ref[...], preferred_element_type=jnp.float32) + b1_ref[...]
    h = jnp.maximum(h, 0.0)                                           # (tm, H) f32

    heads = jnp.dot(h.astype(jnp.bfloat16), wh_ref[...],
                    preferred_element_type=jnp.float32) + bh_ref[...]  # (tm, 128) f32
    # heads lanes: [ mean | mean | s_lin | 0 ]

    lane = jax.lax.broadcasted_iota(jnp.int32, (tm, OUT_LANES), 1)
    # numerically stable softplus over the whole slab (same vreg count either way)
    sp = jnp.maximum(heads, 0.0) + jnp.log1p(jnp.exp(-jnp.abs(heads))) + STD_EPS
    std_lanes = (lane >= 2 * L) & (lane < 3 * L)
    slab = jnp.where(std_lanes, sp, heads)           # [ mean | mean | std | 0 ]

    # Bring std into lanes [0, L) with one lane rotation, then a single FMA gives
    # z = mean + std * eps in lanes [0, L); noise is zero outside [0, L).
    std_low = jnp.roll(slab, -(2 * L), axis=-1)
    out_ref[...] = slab + std_low * noise_ref[...]   # [ z | mean | std | 0 ]


def _pick_block_rows(batch, block_rows):
    if block_rows is not None:
        assert batch % block_rows == 0, "batch must be divisible by block_rows"
        return block_rows
    # Prefer big tiles: >=256 rows fills the v6e/v7x MXU, >=128 fills v5e; VMEM is
    # nowhere near the limit even at 1024 rows of (rows, 768) bf16 double-buffered.
    for cand in (1024, 512, 256, 128, 64, 32, 16, 8):
        if batch % cand == 0:
            return cand
    return batch


def gaussian_network_pallas(x, params, noise, *, block_rows=None):
    """GaussianNetwork forward as one batched Pallas call.

    x     : (B, D) embeddings (bf16 preferred; f32 accepted and cast on the MXU path)
    noise : (B, L) reparameterization epsilon
    """
    B, D = x.shape
    H = params["w1"].shape[1]
    L = LATENT_DIM
    assert params["wh"].shape == (H, OUT_LANES)
    assert noise.shape == (B, L) and 3 * L <= OUT_LANES

    tm = _pick_block_rows(B, block_rows)
    nb = B // tm

    # Host-side zero-pad epsilon to a lane-dense (B, 128) slab: full-lane loads in
    # the kernel, and the zero pad lanes make the FMA a no-op outside [0, L).
    noise_slab = jnp.pad(noise.astype(jnp.float32), ((0, 0), (0, OUT_LANES - L)))

    in_specs = [
        pl.BlockSpec((tm, D), lambda i: (i, 0)),           # x tile per grid step
        pl.BlockSpec((D, H), lambda i: (0, 0)),            # w1: VMEM-resident
        pl.BlockSpec((1, H), lambda i: (0, 0)),            # b1
        pl.BlockSpec((H, OUT_LANES), lambda i: (0, 0)),    # wh packed [Wm|Wm|Ws|0]
        pl.BlockSpec((1, OUT_LANES), lambda i: (0, 0)),    # bh packed [bm|bm|bs|0]
        pl.BlockSpec((tm, OUT_LANES), lambda i: (i, 0)),   # epsilon (lane-dense)
    ]
    out_spec = pl.BlockSpec((tm, OUT_LANES), lambda i: (i, 0))
    out_shape = jax.ShapeDtypeStruct((B, OUT_LANES), jnp.float32)

    cost = pl.CostEstimate(
        flops=2 * B * (D * H + H * OUT_LANES),
        transcendentals=B * OUT_LANES,
        bytes_accessed=int(x.size * x.dtype.itemsize
                           + sum(int(v.size * v.dtype.itemsize) for v in params.values())
                           + noise_slab.size * 4 + B * OUT_LANES * 4),
    )
    # Megacore split only pays off with >=2 grid steps per TensorCore; for tiny
    # grids run single-core so the resident weights are DMA'd once, not per core.
    dim_sem = ("parallel",) if nb >= 4 else ("arbitrary",)

    out = pl.pallas_call(
        _gaussian_kernel,
        grid=(nb,),
        in_specs=in_specs,
        out_specs=out_spec,
        out_shape=out_shape,
        compiler_params=pltpu.CompilerParams(dimension_semantics=dim_sem),
        cost_estimate=cost,
    )(x, params["w1"], params["b1"], params["wh"], params["bh"], noise_slab)

    z = out[:, :L]
    mean = out[:, L:2 * L]
    std = out[:, 2 * L:3 * L]
    return z, mean, std


def init_gaussian_network_params(key, embed_dim=EMBED_DIM, hidden_dim=HIDDEN_DIM,
                                 latent_dim=LATENT_DIM):
    """Deterministic synthetic parameters (PyTorch-Linear-like uniform init)."""
    k1, k2, k3, k4, k5, k6 = jax.random.split(key, 6)

    def uinit(k, shape, fan_in):
        bound = 1.0 / jnp.sqrt(fan_in)
        return jax.random.uniform(k, shape, jnp.float32, -bound, bound)

    w1 = uinit(k1, (embed_dim, hidden_dim), embed_dim)
    b1 = uinit(k2, (1, hidden_dim), embed_dim)
    wm = uinit(k3, (hidden_dim, latent_dim), hidden_dim)
    bm = uinit(k4, (1, latent_dim), hidden_dim)
    ws = uinit(k5, (hidden_dim, latent_dim), hidden_dim)
    bs = uinit(k6, (1, latent_dim), hidden_dim)

    pad_w = jnp.zeros((hidden_dim, OUT_LANES - 3 * latent_dim), jnp.float32)
    pad_b = jnp.zeros((1, OUT_LANES - 3 * latent_dim), jnp.float32)
    return {
        # bf16 storage halves the dominant weight HBM traffic; MXU accumulates in f32.
        "w1": w1.astype(jnp.bfloat16),
        "b1": b1,
        # lane-packed heads: [Wm | Wm | Ws | 0] -> head matmul is already lane-dense.
        "wh": jnp.concatenate([wm, wm, ws, pad_w], axis=1).astype(jnp.bfloat16),
        "bh": jnp.concatenate([bm, bm, bs, pad_b], axis=1),
    }


def language_model_instruction_encoder_forward(embedding, params, noise, *,
                                               block_rows=None):
    """Equivalent of LanguageModelInstructionEncoder.forward (minus the frozen LM).

    Returns (z, dist, mean, std); dist is represented by its (mean, std) parameters.
    """
    z, mean, std = gaussian_network_pallas(embedding, params, noise,
                                           block_rows=block_rows)
    dist = (mean, std)
    return z, dist, mean, std


if __name__ == "__main__":
    key = jax.random.PRNGKey(0)
    k_params, k_embed, k_noise = jax.random.split(key, 3)

    B = 256  # one (256, 768) batch tile: fills the 256-row MXU on v6e/v7x

    # Synthetic stand-in for the frozen LM's CLS embeddings, emitted in bf16 (the
    # fused-producer path); the kernel also accepts f32 and casts on the MXU path.
    embedding = jax.random.normal(k_embed, (B, EMBED_DIM), jnp.float32).astype(jnp.bfloat16)
    noise = jax.random.normal(k_noise, (B, LATENT_DIM), jnp.float32)
    params = init_gaussian_network_params(k_params)

    z, dist, mean, std = language_model_instruction_encoder_forward(
        embedding, params, noise)
    jax.block_until_ready((z, mean, std))

    # Plain-JAX reference (same bf16 matmuls, f32 elementwise math).
    L = LATENT_DIM
    wm = params["wh"][:, :L]
    ws = params["wh"][:, 2 * L:3 * L]
    bm = params["bh"][:, :L]
    bs = params["bh"][:, 2 * L:3 * L]
    h_ref = jnp.maximum(
        jnp.dot(embedding.astype(jnp.bfloat16), params["w1"],
                preferred_element_type=jnp.float32) + params["b1"], 0.0)
    h16 = h_ref.astype(jnp.bfloat16)
    mean_ref = jnp.dot(h16, wm, preferred_element_type=jnp.float32) + bm
    s_ref = jnp.dot(h16, ws, preferred_element_type=jnp.float32) + bs
    std_ref = jnp.maximum(s_ref, 0.0) + jnp.log1p(jnp.exp(-jnp.abs(s_ref))) + STD_EPS
    z_ref = mean_ref + std_ref * noise

    assert z.shape == (B, L) and mean.shape == (B, L) and std.shape == (B, L)
    assert jnp.allclose(mean, mean_ref, atol=1e-2, rtol=1e-2)
    assert jnp.allclose(std, std_ref, atol=1e-2, rtol=1e-2)
    assert jnp.allclose(z, z_ref, atol=1e-2, rtol=1e-2)
    assert bool(jnp.all(std > 0.0))
    assert bool(jnp.all(jnp.isfinite(z)))

    print("KERNEL_OK")
</pallas_src>

<mosaic_0001>
module attributes {stable_mosaic.version = 11 : i64} {
  func.func @_gaussian_kernel(%arg0: i32, %arg1: memref<256x768xbf16, #tpu.memory_space<vmem>>, %arg2: memref<768x256xbf16, #tpu.memory_space<vmem>>, %arg3: memref<1x256xf32, #tpu.memory_space<vmem>>, %arg4: memref<256x128xbf16, #tpu.memory_space<vmem>>, %arg5: memref<1x128xf32, #tpu.memory_space<vmem>>, %arg6: memref<256x128xf32, #tpu.memory_space<vmem>>, %arg7: memref<256x128xf32, #tpu.memory_space<vmem>>) attributes {dimension_semantics = [#tpu.dimension_semantics<arbitrary>], iteration_bounds = array<i64: 1>, scalar_prefetch = 0 : i64, scratch_operands = 0 : i64, tpu.core_type = #tpu.core_type<tc>, window_params = [{transform_indices = @transform_0, window_bounds = array<i64: 256, 768>}, {pipeline_mode = #tpu.pipeline_mode<synchronous>, transform_indices = @transform_1, window_bounds = array<i64: 768, 256>}, {pipeline_mode = #tpu.pipeline_mode<synchronous>, transform_indices = @transform_2, window_bounds = array<i64: 1, 256>}, {pipeline_mode = #tpu.pipeline_mode<synchronous>, transform_indices = @transform_3, window_bounds = array<i64: 256, 128>}, {pipeline_mode = #tpu.pipeline_mode<synchronous>, transform_indices = @transform_4, window_bounds = array<i64: 1, 128>}, {transform_indices = @transform_5, window_bounds = array<i64: 256, 128>}, {transform_indices = @transform_6, window_bounds = array<i64: 256, 128>}]} {
    %c0 = arith.constant 0 : index
    %c0_0 = arith.constant 0 : index
    %0 = vector.load %arg1[%c0, %c0_0] : memref<256x768xbf16, #tpu.memory_space<vmem>>, vector<256x768xbf16>
    %c0_1 = arith.constant 0 : index
    %c0_2 = arith.constant 0 : index
    %1 = vector.load %arg2[%c0_1, %c0_2] : memref<768x256xbf16, #tpu.memory_space<vmem>>, vector<768x256xbf16>
    %cst = arith.constant dense<0.000000e+00> : vector<256x256xf32>
    %2 = tpu.matmul %0, %1, %cst {dimension_numbers = #tpu.dot_dimension_numbers<[1], [0], [0], [1], [0, 0, 1, 1], [], []>} : vector<256x768xbf16>, vector<768x256xbf16>, vector<256x256xf32> -> vector<256x256xf32>
    %c0_3 = arith.constant 0 : index
    %c0_4 = arith.constant 0 : index
    %3 = vector.load %arg3[%c0_3, %c0_4] : memref<1x256xf32, #tpu.memory_space<vmem>>, vector<1x256xf32>
    %4 = vector.broadcast %3 : vector<1x256xf32> to vector<256x256xf32>
    %5 = arith.addf %2, %4 : vector<256x256xf32>
    %cst_5 = arith.constant 0.000000e+00 : f32
    %6 = vector.broadcast %cst_5 : f32 to vector<256x256xf32>
    %7 = arith.maximumf %5, %6 : vector<256x256xf32>
    %8 = arith.truncf %7 : vector<256x256xf32> to vector<256x256xbf16>
    %c0_6 = arith.constant 0 : index
    %c0_7 = arith.constant 0 : index
    %9 = vector.load %arg4[%c0_6, %c0_7] : memref<256x128xbf16, #tpu.memory_space<vmem>>, vector<256x128xbf16>
    %cst_8 = arith.constant dense<0.000000e+00> : vector<256x128xf32>
    %10 = tpu.matmul %8, %9, %cst_8 {dimension_numbers = #tpu.dot_dimension_numbers<[1], [0], [0], [1], [0, 0, 1, 1], [], []>} : vector<256x256xbf16>, vector<256x128xbf16>, vector<256x128xf32> -> vector<256x128xf32>
    %c0_9 = arith.constant 0 : index
    %c0_10 = arith.constant 0 : index
    %11 = vector.load %arg5[%c0_9, %c0_10] : memref<1x128xf32, #tpu.memory_space<vmem>>, vector<1x128xf32>
    %12 = vector.broadcast %11 : vector<1x128xf32> to vector<256x128xf32>
    %13 = arith.addf %10, %12 : vector<256x128xf32>
    %14 = tpu.iota {dimensions = array<i32: 1>} : vector<256x128xi32>
    %cst_11 = arith.constant 0.000000e+00 : f32
    %15 = vector.broadcast %cst_11 : f32 to vector<256x128xf32>
    %16 = arith.maximumf %13, %15 : vector<256x128xf32>
    %17 = math.absf %13 : vector<256x128xf32>
    %cst_12 = arith.constant 0.000000e+00 : f32
    %18 = vector.broadcast %cst_12 : f32 to vector<256x128xf32>
    %19 = arith.subf %18, %17 : vector<256x128xf32>
    %20 = math.exp %19 : vector<256x128xf32>
    %21 = math.log1p %20 : vector<256x128xf32>
    %22 = arith.addf %16, %21 : vector<256x128xf32>
    %cst_13 = arith.constant 9.99999974E-5 : f32
    %23 = vector.broadcast %cst_13 : f32 to vector<256x128xf32>
    %24 = arith.addf %22, %23 : vector<256x128xf32>
    %c64_i32 = arith.constant 64 : i32
    %25 = vector.broadcast %c64_i32 : i32 to vector<256x128xi32>
    %26 = arith.cmpi sge, %14, %25 : vector<256x128xi32>
    %c96_i32 = arith.constant 96 : i32
    %27 = vector.broadcast %c96_i32 : i32 to vector<256x128xi32>
    %28 = arith.cmpi slt, %14, %27 : vector<256x128xi32>
    %29 = arith.andi %26, %28 : vector<256x128xi1>
    %30 = arith.select %29, %24, %13 : vector<256x128xi1>, vector<256x128xf32>
    %31 = vector.extract_strided_slice %30 {offsets = [0, 64], sizes = [256, 64], strides = [1, 1]} : vector<256x128xf32> to vector<256x64xf32>
    %32 = vector.extract_strided_slice %30 {offsets = [0, 0], sizes = [256, 64], strides = [1, 1]} : vector<256x128xf32> to vector<256x64xf32>
    %33 = tpu.concatenate %31, %32 in 1 : vector<256x64xf32>, vector<256x64xf32> -> vector<256x128xf32>
    %c0_14 = arith.constant 0 : index
    %c0_15 = arith.constant 0 : index
    %34 = vector.load %arg6[%c0_14, %c0_15] : memref<256x128xf32, #tpu.memory_space<vmem>>, vector<256x128xf32>
    %35 = arith.mulf %33, %34 : vector<256x128xf32>
    %36 = arith.addf %30, %35 : vector<256x128xf32>
    %c0_16 = arith.constant 0 : index
    %c0_17 = arith.constant 0 : index
    %37 = vector.load %arg7[%c0_16, %c0_17] : memref<256x128xf32, #tpu.memory_space<vmem>>, vector<256x128xf32>
    tpu.vector_store %arg7[%c0_16, %c0_17], %36 {strides = array<i32>} : memref<256x128xf32, #tpu.memory_space<vmem>>, vector<256x128xf32>,
    return
  }
  func.func @transform_0(%arg0: i32) -> (i32, i32) {
    %c0_i32 = arith.constant 0 : i32
    %c0_i32_0 = arith.constant 0 : i32
    return %arg0, %c0_i32 : i32, i32
  }
  func.func @transform_1(%arg0: i32) -> (i32, i32) {
    %c0_i32 = arith.constant 0 : i32
    %c0_i32_0 = arith.constant 0 : i32
    %c0_i32_1 = arith.constant 0 : i32
    return %c0_i32, %c0_i32_0 : i32, i32
  }
  func.func @transform_2(%arg0: i32) -> (i32, i32) {
    %c0_i32 = arith.constant 0 : i32
    %c0_i32_0 = arith.constant 0 : i32
    %c0_i32_1 = arith.constant 0 : i32
    return %c0_i32, %c0_i32_0 : i32, i32
  }
  func.func @transform_3(%arg0: i32) -> (i32, i32) {
    %c0_i32 = arith.constant 0 : i32
    %c0_i32_0 = arith.constant 0 : i32
    %c0_i32_1 = arith.constant 0 : i32
    return %c0_i32, %c0_i32_0 : i32, i32
  }
  func.func @transform_4(%arg0: i32) -> (i32, i32) {
    %c0_i32 = arith.constant 0 : i32
    %c0_i32_0 = arith.constant 0 : i32
    %c0_i32_1 = arith.constant 0 : i32
    return %c0_i32, %c0_i32_0 : i32, i32
  }
  func.func @transform_5(%arg0: i32) -> (i32, i32) {
    %c0_i32 = arith.constant 0 : i32
    %c0_i32_0 = arith.constant 0 : i32
    return %arg0, %c0_i32 : i32, i32
  }
  func.func @transform_6(%arg0: i32) -> (i32, i32) {
    %c0_i32 = arith.constant 0 : i32
    %c0_i32_0 = arith.constant 0 : i32
    return %arg0, %c0_i32 : i32, i32
  }
}

</mosaic_0001>

<bundles_post_ra>
// kernel: tpu_custom_call.1
= control target key start
LH: loop header
LB: loop body
LE: loop exit
PB: predicated region body
PF: predicated region fallthrough
CT: control target
= control target key end

     0   :  { %11 = vsyncpa [#allocation3], 0  ;;  %s5265_s0 = inlined_call_operand.hbm [shape: bf16[256,768], index: 0, kind: input, shape index: {}]   ;;  %s5266_s1 = inlined_call_operand.hbm [shape: bf16[768,256], index: 1, kind: input, shape index: {}]   ;;  %s5267_s2 = inlined_call_operand.vmem [shape: f32[1,256], index: 2, kind: input, shape index: {}]   ;;  %s5268_s3 = inlined_call_operand.hbm [shape: bf16[256,128], index: 3, kind: input, shape index: {}]   ;;  %s5269_s4 = inlined_call_operand.vmem [shape: f32[1,128], index: 4, kind: input, shape index: {}]   ;;  %s5270_s5 = inlined_call_operand.hbm [shape: f32[256,128], index: 5, kind: input, shape index: {}]   ;;  %s5271_s6 = inlined_call_operand.hbm [shape: f32[256,128], index: 6, kind: output, shape index: {}]  }
   0x1   :  { %12 = vsyncpa [#allocation6], 0 }
   0x2   :  { %13 = vsyncpa [#allocation9], 0 }
   0x3   :  { %14 = vsyncpa [#allocation4], 0  ;;  %s4114_s21 = smov [#allocation5]   ;;  %s3996_s25 = scalar_lea.hbm %s5266_s1, 12288 }
   0x4   :  { %s32_s22 = sshll.u32 %s4114_s21, 4  ;;  %p3997_p0 = scmp.ne.s32.totalorder %s5266_s1, %s3996_s25  ;;  %s33_s22 = int_to_ptr.vmem [resolvable:$true] %s32_s22 }
   0x5   :  { %p4000_p1 = scmp.lt.u32.totalorder %s3996_s25, %s5266_s1 }
   0x7   :  { %p4002_p2 = pnand %p4000_p1, %p3997_p0 }
   0x9   :  { %4005 = shalt.err (!%p4002_p2)
}
   0xa   :  { %s4006_s30 = scalar_lea.vmem %s33_s22, 12288  ;;  %p4011_p4 = scmp.lt.s32.totalorder %s33_s22, %s33_s22 }
   0xb   :  { %p4007_p3 = scmp.ne.s32.totalorder %s33_s22, %s4006_s30  ;;  %p4012_p5 = scmp.lt.s32.totalorder %s4006_s30, %s4006_s30 }
   0xd   :  { %p4013_p6 = por %p4012_p5, %p4011_p4 }
   0xf   :  { %p4014_p7 = pnand %p4013_p6, %p4007_p3 }
  0x11   :  { %4017 = shalt.err (!%p4014_p7)
}
  0x12   :  { %s4115_s7 = smov 128   ;;  %s4116_s8 = smov 8  }
  0x13   :  { %38 = dma.hbm_to_vmem [thread:$0]  %s5266_s1, 12288, %s33_s22, [#allocation6], %s4115_s7, %s4115_s7, %s4116_s8  }
  0x14   :  { %s4117_s11 = smov [#allocation2]   ;;  %s4018_s15 = scalar_lea.hbm %s5265_s0, 12288 }
  0x15   :  { %s20_s12 = sshll.u32 %s4117_s11, 4  ;;  %p4019_p8 = scmp.ne.s32.totalorder %s5265_s0, %s4018_s15  ;;  %s21_s12 = int_to_ptr.vmem [resolvable:$true] %s20_s12 }
  0x16   :  { %p4022_p9 = scmp.lt.u32.totalorder %s4018_s15, %s5265_s0 }
  0x18   :  { %p4024_p10 = pnand %p4022_p9, %p4019_p8 }
  0x1a   :  { %4027 = shalt.err (!%p4024_p10)
}
  0x1b   :  { %s4028_s20 = scalar_lea.vmem %s21_s12, 12288  ;;  %p4033_p12 = scmp.lt.s32.totalorder %s21_s12, %s21_s12 }
  0x1c   :  { %p4029_p11 = scmp.ne.s32.totalorder %s21_s12, %s4028_s20  ;;  %p4034_p13 = scmp.lt.s32.totalorder %s4028_s20, %s4028_s20 }
  0x1e   :  { %p4035_p0 = por %p4034_p13, %p4033_p12 }
  0x20   :  { %p4036_p1 = pnand %p4035_p0, %p4029_p11 }
  0x22   :  { %4039 = shalt.err (!%p4036_p1)
}
  0x23   :  { %s4118_s1 = smov 384   ;;  %s4119_s21 = smov 24  }
  0x24   :  { %26 = dma.hbm_to_vmem [thread:$0]  %s5265_s0, 12288, %s21_s12, [#allocation3], %s4118_s1, %s4118_s1, %s4119_s21  }
  0x25   :  { %s4120_s24 = smov [#allocation7]   ;;  %s4040_s28 = scalar_lea.hbm %s5268_s3, 2048 }
  0x26   :  { %s46_s25 = sshll.u32 %s4120_s24, 4  ;;  %p4041_p2 = scmp.ne.s32.totalorder %s5268_s3, %s4040_s28  ;;  %s47_s25 = int_to_ptr.vmem [resolvable:$true] %s46_s25 }
  0x27   :  { %p4044_p3 = scmp.lt.u32.totalorder %s4040_s28, %s5268_s3 }
  0x29   :  { %p4046_p4 = pnand %p4044_p3, %p4041_p2 }
  0x2b   :  { %4049 = shalt.err (!%p4046_p4)
}
  0x2c   :  { %s4050_s11 = scalar_lea.vmem %s47_s25, 2048  ;;  %p4055_p6 = scmp.lt.s32.totalorder %s47_s25, %s47_s25 }
  0x2d   :  { %p4051_p5 = scmp.ne.s32.totalorder %s47_s25, %s4050_s11  ;;  %p4056_p7 = scmp.lt.s32.totalorder %s4050_s11, %s4050_s11 }
  0x2f   :  { %p4057_p8 = por %p4056_p7, %p4055_p6 }
  0x31   :  { %p4058_p9 = pnand %p4057_p8, %p4051_p5 }
  0x33   :  { %4061 = shalt.err (!%p4058_p9)
}
  0x34   :  { %s4121_s0 = smov 64   ;;  %s4122_s12 = smov 4  }
  0x35   :  { %52 = dma.hbm_to_vmem [thread:$0]  %s5268_s3, 2048, %s47_s25, [#allocation6], %s4121_s0, %s4121_s0, %s4122_s12  }
  0x36   :  { %s4123_s15 = smov [#allocation8]   ;;  %s4062_s19 = scalar_lea.hbm %s5270_s5, 4096 }
  0x37   :  { %s60_s16 = sshll.u32 %s4123_s15, 4  ;;  %p4063_p10 = scmp.ne.s32.totalorder %s5270_s5, %s4062_s19  ;;  %s61_s16 = int_to_ptr.vmem [resolvable:$true] %s60_s16 }
  0x38   :  { %p4066_p11 = scmp.lt.u32.totalorder %s4062_s19, %s5270_s5 }
  0x3a   :  { %p4068_p12 = pnand %p4066_p11, %p4063_p10 }
  0x3c   :  { %4071 = shalt.err (!%p4068_p12)
}
  0x3d   :  { %s4072_s23 = scalar_lea.vmem %s61_s16, 4096  ;;  %p4077_p0 = scmp.lt.s32.totalorder %s61_s16, %s61_s16 }
  0x3e   :  { %p4073_p13 = scmp.ne.s32.totalorder %s61_s16, %s4072_s23  ;;  %p4078_p1 = scmp.lt.s32.totalorder %s4072_s23, %s4072_s23 }
  0x40   :  { %p4079_p2 = por %p4078_p1, %p4077_p0 }
  0x42   :  { %p4080_p3 = pnand %p4079_p2, %p4073_p13 }
  0x44   :  { %4083 = shalt.err (!%p4080_p3)
}
  0x45   :  { %66 = dma.hbm_to_vmem [thread:$0]  %s5270_s5, 4096, %s61_s16, [#allocation9], %s4115_s7, %s4115_s7, %s4116_s8  }
  0x46   :  { %4106 = dma.done.wait [#allocation3], 12288  }
  0x47   :  { %4107 = vsyncadd [#allocation3], 4294955008 }
  0x48   :  { %4108 = dma.done.wait [#allocation6], 14336  }
  0x49   :  { %4109 = vsyncadd [#allocation6], 4294952960 }
  0x4a   :  { %4110 = dma.done.wait [#allocation9], 4096  }
  0x4b   :  { %4111 = vsyncadd [#allocation9], 4294963200  ;;  %v3563_v0 = vld [vmem:[#allocation5 + $0x104] ss:$8 sps:$4 sm:$0xff]   ;;  %v3565_v1 = vld [vmem:[#allocation5 + $0x100] ss:$8 sps:$4 sm:$0xff]  }
  0x4c   :  { %1437 = vmatprep.subr.bf16.mxu0 %v3563_v0  ;;  %v3566_v2 = vld [vmem:[#allocation5 + $0x114] ss:$8 sps:$4 sm:$0xff]   ;;  %v3568_v3 = vld [vmem:[#allocation5 + $0x110] ss:$8 sps:$4 sm:$0xff]   ;;  %v3569_v4 = vld [vmem:[#allocation5 + $0x124] ss:$8 sps:$4 sm:$0xff]  }
  0x4d   :  { %1438 = vmatpush1.bf16.msra.mxu0 %v3565_v1  ;;  %v3571_v5 = vld [vmem:[#allocation5 + $0x120] ss:$8 sps:$4 sm:$0xff]   ;;  %v3572_v6 = vld [vmem:[#allocation5 + $0x134] ss:$8 sps:$4 sm:$0xff]   ;;  %v3574_v7 = vld [vmem:[#allocation5 + $0x130] ss:$8 sps:$4 sm:$0xff]  }
  0x4e   :  { %1439 = vmatprep.subr.bf16.mxu0 %v3566_v2  ;;  %v3575_v8 = vld [vmem:[#allocation5 + $0x144] ss:$8 sps:$4 sm:$0xff]   ;;  %v3577_v9 = vld [vmem:[#allocation5 + $0x140] ss:$8 sps:$4 sm:$0xff]   ;;  %v3578_v10 = vld [vmem:[#allocation5 + $0x154] ss:$8 sps:$4 sm:$0xff]  }
  0x4f   :  { %v3580_v11 = vld [vmem:[#allocation5 + $0x150] ss:$8 sps:$4 sm:$0xff]   ;;  %v3581_v12 = vld [vmem:[#allocation5 + $0x164] ss:$8 sps:$4 sm:$0xff]   ;;  %v3583_v14 = vld [vmem:[#allocation5 + $0x160] ss:$8 sps:$4 sm:$0xff]  }
  0x50   :  { %v3613_v13 = vld [vmem:[#allocation2 + $0xc] ss:$24 sps:$4 sm:$0xff]   ;;  %v3584_v15 = vld [vmem:[#allocation5 + $0x174] ss:$8 sps:$4 sm:$0xff]   ;;  %v3586_v16 = vld [vmem:[#allocation5 + $0x170] ss:$8 sps:$4 sm:$0xff]  }
  0x51   :  { %1440 = vmatpush1.bf16.msra.mxu0 %v3568_v3  ;;  %1469 = vmatprep.mubr.bf16.mxu0 %v3613_v13  ;;  %v3587_v17 = vld [vmem:[#allocation5 + $0x184] ss:$8 sps:$4 sm:$0xff]   ;;  %v3589_v18 = vld [vmem:[#allocation5 + $0x180] ss:$8 sps:$4 sm:$0xff]   ;;  %v3590_v19 = vld [vmem:[#allocation5 + $0x194] ss:$8 sps:$4 sm:$0xff]  }
  0x52   :  { %1441 = vmatprep.subr.bf16.mxu0 %v3569_v4  ;;  %v3592_v20 = vld [vmem:[#allocation5 + $0x190] ss:$8 sps:$4 sm:$0xff]   ;;  %v3593_v21 = vld [vmem:[#allocation5 + $0x1a4] ss:$8 sps:$4 sm:$0xff]   ;;  %v3595_v22 = vld [vmem:[#allocation5 + $0x1a0] ss:$8 sps:$4 sm:$0xff]  }
  0x53   :  { %v3596_v23 = vld [vmem:[#allocation5 + $0x1b4] ss:$8 sps:$4 sm:$0xff]   ;;  %v3598_v24 = vld [vmem:[#allocation5 + $0x1b0] ss:$8 sps:$4 sm:$0xff]   ;;  %v3659_v25 = vld [vmem:[#allocation5 + $0x4] ss:$8 sps:$4 sm:$0xff]  }
  0x54   :  { %v3661_v26 = vld [vmem:[#allocation5] ss:$8 sps:$4 sm:$0xff]   ;;  %v3599_v27 = vld [vmem:[#allocation5 + $0x1c4] ss:$8 sps:$4 sm:$0xff]   ;;  %1244 = vmatprep.subr.bf16.mxu1 %v3659_v25  ;;  %v3664_v28 = vld [vmem:[#allocation5 + $0x14] ss:$8 sps:$4 sm:$0xff]  }
  0x55   :  { %1442 = vmatpush1.bf16.msra.mxu0 %v3571_v5  ;;  %1245 = vmatpush1.bf16.msra.mxu1 %v3661_v26  ;;  %v3601_v29 = vld [vmem:[#allocation5 + $0x1c0] ss:$8 sps:$4 sm:$0xff]   ;;  %v3602_v30 = vld [vmem:[#allocation5 + $0x1d4] ss:$8 sps:$4 sm:$0xff]   ;;  %v3670_v31 = vld [vmem:[#allocation5 + $0x10] ss:$8 sps:$4 sm:$0xff]  }
  0x56   :  { %1443 = vmatprep.subr.bf16.mxu0 %v3572_v6  ;;  %1246 = vmatprep.subr.bf16.mxu1 %v3664_v28  ;;  %v3671_v32 = vld [vmem:[#allocation5 + $0x24] ss:$8 sps:$4 sm:$0xff]   ;;  %v3673_v33 = vld [vmem:[#allocation5 + $0x20] ss:$8 sps:$4 sm:$0xff]   ;;  %v3604_v34 = vld [vmem:[#allocation5 + $0x1d0] ss:$8 sps:$4 sm:$0xff]  }
  0x57   :  { %v3676_v35 = vld [vmem:[#allocation5 + $0x34] ss:$8 sps:$4 sm:$0xff]   ;;  %v3605_v36 = vld [vmem:[#allocation5 + $0x1e4] ss:$8 sps:$4 sm:$0xff]   ;;  %v3607_v37 = vld [vmem:[#allocation5 + $0x1e0] ss:$8 sps:$4 sm:$0xff]  }
  0x58   :  { %v3682_v38 = vld [vmem:[#allocation5 + $0x30] ss:$8 sps:$4 sm:$0xff]   ;;  %v3683_v39 = vld [vmem:[#allocation5 + $0x44] ss:$8 sps:$4 sm:$0xff]   ;;  %v3608_v40 = vld [vmem:[#allocation5 + $0x1f4] ss:$8 sps:$4 sm:$0xff]  }
  0x59   :  { %1444 = vmatpush1.bf16.msra.mxu0 %v3574_v7  ;;  %1247 = vmatpush1.bf16.msra.mxu1 %v3670_v31  ;;  %v3685_v41 = vld [vmem:[#allocation5 + $0x40] ss:$8 sps:$4 sm:$0xff]   ;;  %v3610_v42 = vld [vmem:[#allocation5 + $0x1f0] ss:$8 sps:$4 sm:$0xff]   ;;  %v3688_v43 = vld [vmem:[#allocation5 + $0x54] ss:$8 sps:$4 sm:$0xff]  }
  0x5a   :  { %1445 = vmatprep.subr.bf16.mxu0 %v3575_v8  ;;  %1248 = vmatprep.subr.bf16.mxu1 %v3671_v32  ;;  %v3616_v44 = vld [vmem:[#allocation5 + $0x204] ss:$8 sps:$4 sm:$0xff]   ;;  %v3611_v45 = vld [vmem:[#allocation2 + $0x8] ss:$24 sps:$4 sm:$0xff]   ;;  %v3694_v46 = vld [vmem:[#allocation5 + $0x50] ss:$8 sps:$4 sm:$0xff]  }
  0x5b   :  { %v3614_v47 = vld [vmem:[#allocation5 + $0x200] ss:$8 sps:$4 sm:$0xff]   ;;  %v3617_v48 = vld [vmem:[#allocation2 + $0x3c] ss:$24 sps:$4 sm:$0xff]   ;;  %v3695_v50 = vld [vmem:[#allocation5 + $0x64] ss:$8 sps:$4 sm:$0xff]  }
  0x5c   :  { %v3622_v49 = vld [vmem:[#allocation5 + $0x214] ss:$8 sps:$4 sm:$0xff]   ;;  %v3697_v51 = vld [vmem:[#allocation5 + $0x60] ss:$8 sps:$4 sm:$0xff]   ;;  %v3620_v52 = vld [vmem:[#allocation5 + $0x210] ss:$8 sps:$4 sm:$0xff]  }
  0x5d   :  { %1446 = vmatpush1.bf16.msra.mxu0 %v3577_v9  ;;  %1249 = vmatpush1.bf16.msra.mxu1 %v3673_v33  ;;  %v3700_v53 = vld [vmem:[#allocation5 + $0x74] ss:$8 sps:$4 sm:$0xff]   ;;  %v3628_v54 = vld [vmem:[#allocation5 + $0x224] ss:$8 sps:$4 sm:$0xff]   ;;  %v3619_v55 = vld [vmem:[#allocation2 + $0x38] ss:$24 sps:$4 sm:$0xff]  }
  0x5e   :  { %1447 = vmatprep.subr.bf16.mxu0 %v3578_v10  ;;  %1250 = vmatprep.subr.bf16.mxu1 %v3676_v35  ;;  %v3623_v56 = vld [vmem:[#allocation2 + $0x6c] ss:$24 sps:$4 sm:$0xff]   ;;  %v3706_v57 = vld [vmem:[#allocation5 + $0x70] ss:$8 sps:$4 sm:$0xff]   ;;  %v3626_v58 = vld [vmem:[#allocation5 + $0x220] ss:$8 sps:$4 sm:$0xff]  }
  0x5f   :  { %v3634_v59 = vld [vmem:[#allocation5 + $0x234] ss:$8 sps:$4 sm:$0xff]   ;;  %v3707_v60 = vld [vmem:[#allocation5 + $0x84] ss:$8 sps:$4 sm:$0xff]   ;;  %v3709_v61 = vld [vmem:[#allocation5 + $0x80] ss:$8 sps:$4 sm:$0xff]  }
  0x60   :  { %v3632_v62 = vld [vmem:[#allocation5 + $0x230] ss:$8 sps:$4 sm:$0xff]   ;;  %v3712_v63 = vld [vmem:[#allocation5 + $0x94] ss:$8 sps:$4 sm:$0xff]   ;;  %v3640_v0 = vld [vmem:[#allocation5 + $0x244] ss:$8 sps:$4 sm:$0xff]  }
  0x61   :  { %1448 = vmatpush1.bf16.msra.mxu0 %v3580_v11  ;;  %1251 = vmatpush1.bf16.msra.mxu1 %v3682_v38  ;;  %v3625_v1 = vld [vmem:[#allocation2 + $0x68] ss:$24 sps:$4 sm:$0xff]   ;;  %v3718_v2 = vld [vmem:[#allocation5 + $0x90] ss:$8 sps:$4 sm:$0xff]   ;;  %v3629_v3 = vld [vmem:[#allocation2 + $0x9c] ss:$24 sps:$4 sm:$0xff]  }
  0x62   :  { %1449 = vmatprep.subr.bf16.mxu0 %v3581_v12  ;;  %1252 = vmatprep.subr.bf16.mxu1 %v3683_v39  ;;  %v3638_v4 = vld [vmem:[#allocation5 + $0x240] ss:$8 sps:$4 sm:$0xff]   ;;  %v3646_v5 = vld [vmem:[#allocation5 + $0x254] ss:$8 sps:$4 sm:$0xff]   ;;  %v3719_v6 = vld [vmem:[#allocation5 + $0xa4] ss:$8 sps:$4 sm:$0xff]  }
  0x63   :  { %v3721_v7 = vld [vmem:[#allocation5 + $0xa0] ss:$8 sps:$4 sm:$0xff]   ;;  %v3644_v8 = vld [vmem:[#allocation5 + $0x250] ss:$8 sps:$4 sm:$0xff]   ;;  %v3724_v9 = vld [vmem:[#allocation5 + $0xb4] ss:$8 sps:$4 sm:$0xff]  }
  0x64   :  { %v3631_v10 = vld [vmem:[#allocation2 + $0x98] ss:$24 sps:$4 sm:$0xff]   ;;  %v3652_v11 = vld [vmem:[#allocation5 + $0x264] ss:$8 sps:$4 sm:$0xff]   ;;  %v3667_v25 = vld [vmem:[#allocation5 + $0x280] ss:$8 sps:$4 sm:$0xff]  }
  0x65   :  { %1450 = vmatpush1.bf16.msra.mxu0 %v3583_v14  ;;  %1253 = vmatpush1.bf16.msra.mxu1 %v3685_v41  ;;  %v3635_v12 = vld [vmem:[#allocation2 + $0xcc] ss:$24 sps:$4 sm:$0xff]   ;;  %v3730_v13 = vld [vmem:[#allocation5 + $0xb0] ss:$8 sps:$4 sm:$0xff]   ;;  %v3681_v26 = vld [vmem:[#allocation5 + $0x294] ss:$8 sps:$4 sm:$0xff]  }
  0x66   :  { %1451 = vmatprep.subr.bf16.mxu0 %v3584_v15  ;;  %1254 = vmatprep.subr.bf16.mxu1 %v3688_v43  ;;  %v3757_v14 = vld [vmem:[#allocation2 + $0x4] ss:$24 sps:$4 sm:$0xff]   ;;  %v3650_v15 = vld [vmem:[#allocation5 + $0x260] ss:$8 sps:$4 sm:$0xff]   ;;  %v3643_v31 = vld [vmem:[#allocation2 + $0xf8] ss:$24 sps:$4 sm:$0xff]  }
  0x67   :  { %1276 = vmatprep.mubr.bf16.mxu1 %v3757_v14  ;;  %v3745_v28 = vld [vmem:[#allocation5 + $0xe0] ss:$8 sps:$4 sm:$0xff]   ;;  %v3693_v32 = vld [vmem:[#allocation5 + $0x2a4] ss:$8 sps:$4 sm:$0xff]   ;;  %v3754_v35 = vld [vmem:[#allocation5 + $0xf0] ss:$8 sps:$4 sm:$0xff]  }
  0x68   :  { %v3647_v33 = vld [vmem:[#allocation2 + $0x12c] ss:$24 sps:$4 sm:$0xff]   ;;  %v3703_v38 = vld [vmem:[#allocation5 + $0x2b0] ss:$8 sps:$4 sm:$0xff]   ;;  %v3649_v41 = vld [vmem:[#allocation2 + $0x128] ss:$24 sps:$4 sm:$0xff]  }
  0x69   :  { %1452 = vmatpush1.bf16.msra.mxu0 %v3586_v16  ;;  %1255 = vmatpush1.bf16.msra.mxu1 %v3694_v46  ;;  %v3658_v16 = vld [vmem:[#allocation5 + $0x274] ss:$8 sps:$4 sm:$0xff]   ;;  %v3715_v43 = vld [vmem:[#allocation5 + $0x2c0] ss:$8 sps:$4 sm:$0xff]   ;;  %v3727_v46 = vld [vmem:[#allocation5 + $0x2d0] ss:$8 sps:$4 sm:$0xff]  }
  0x6a   :  { %1453 = vmatprep.subr.bf16.mxu0 %v3587_v17  ;;  %1256 = vmatprep.subr.bf16.mxu1 %v3695_v50  ;;  %v3731_v17 = vld [vmem:[#allocation5 + $0xc4] ss:$8 sps:$4 sm:$0xff]   ;;  %v3726_v14 = vld [vmem:[#allocation2 + $0x278] ss:$24 sps:$4 sm:$0xff]  }
  0x6b   :  { %v3761_v39 = vld [vmem:[#allocation2 + $0x34] ss:$24 sps:$4 sm:$0xff]  }
  0x6c   :  { %v3662_v50 = vld [vmem:[#allocation2 + $0x18c] ss:$24 sps:$4 sm:$0xff]  }
  0x6d   :  { %1454 = vmatpush1.bf16.msra.mxu0 %v3589_v18  ;;  %1257 = vmatpush1.bf16.msra.mxu1 %v3697_v51  ;;  %v3733_v18 = vld [vmem:[#allocation5 + $0xc0] ss:$8 sps:$4 sm:$0xff]  }
  0x6e   :  { %1455 = vmatprep.subr.bf16.mxu0 %v3590_v19  ;;  %1258 = vmatprep.subr.bf16.mxu1 %v3700_v53  ;;  %v3656_v19 = vld [vmem:[#allocation5 + $0x270] ss:$8 sps:$4 sm:$0xff]   ;;  %v3739_v51 = vld [vmem:[#allocation5 + $0x2e0] ss:$8 sps:$4 sm:$0xff]  }
  0x6f   :  { %v3769_v53 = vld [vmem:[#allocation2 + $0x60] ss:$24 sps:$4 sm:$0xff]  }
  0x71   :  { %1456 = vmatpush1.bf16.msra.mxu0 %v3592_v20  ;;  %1259 = vmatpush1.bf16.msra.mxu1 %v3706_v57  ;;  %v3736_v20 = vld [vmem:[#allocation5 + $0xd4] ss:$8 sps:$4 sm:$0xff]  }
  0x72   :  { %1457 = vmatprep.subr.bf16.mxu0 %v3593_v21  ;;  %1260 = vmatprep.subr.bf16.mxu1 %v3707_v60  ;;  %v3669_v21 = vld [vmem:[#allocation5 + $0x284] ss:$8 sps:$4 sm:$0xff]   ;;  %v3674_v57 = vld [vmem:[#allocation2 + $0x1bc] ss:$24 sps:$4 sm:$0xff]   ;;  %v3678_v60 = vld [vmem:[#allocation2 + $0x1b8] ss:$24 sps:$4 sm:$0xff]  }
  0x75   :  { %1458 = vmatpush1.bf16.msra.mxu0 %v3595_v22  ;;  %1261 = vmatpush1.bf16.msra.mxu1 %v3709_v61  ;;  %v3637_v22 = vld [vmem:[#allocation2 + $0xc8] ss:$24 sps:$4 sm:$0xff]   ;;  %v3686_v61 = vld [vmem:[#allocation2 + $0x1ec] ss:$24 sps:$4 sm:$0xff]  }
  0x76   :  { %1459 = vmatprep.subr.bf16.mxu0 %v3596_v23  ;;  %1262 = vmatprep.subr.bf16.mxu1 %v3712_v63  ;;  %v3641_v23 = vld [vmem:[#allocation2 + $0xfc] ss:$24 sps:$4 sm:$0xff]  }
  0x77   :  { %v3785_v63 = vld [vmem:[#allocation2 + $0xf4] ss:$24 sps:$4 sm:$0xff]  }
  0x79   :  { %1460 = vmatpush1.bf16.msra.mxu0 %v3598_v24  ;;  %1263 = vmatpush1.bf16.msra.mxu1 %v3718_v2  ;;  %v3742_v24 = vld [vmem:[#allocation5 + $0xd0] ss:$8 sps:$4 sm:$0xff]  }
  0x7a   :  { %1461 = vmatprep.subr.bf16.mxu0 %v3599_v27  ;;  %1264 = vmatprep.subr.bf16.mxu1 %v3719_v6  ;;  %v3743_v27 = vld [vmem:[#allocation5 + $0xe4] ss:$8 sps:$4 sm:$0xff]   ;;  %v3787_v2 = vld [vmem:[#allocation2 + $0xf0] ss:$24 sps:$4 sm:$0xff]   ;;  %v3793_v6 = vld [vmem:[#allocation2 + $0x120] ss:$24 sps:$4 sm:$0xff]  }
  0x7d   :  { %1462 = vmatpush1.bf16.msra.mxu0 %v3601_v29  ;;  %1265 = vmatpush1.bf16.msra.mxu1 %v3721_v7  ;;  %v3679_v29 = vld [vmem:[#allocation5 + $0x290] ss:$8 sps:$4 sm:$0xff]   ;;  %v3797_v7 = vld [vmem:[#allocation2 + $0x154] ss:$24 sps:$4 sm:$0xff]  }
  0x7e   :  { %1463 = vmatprep.subr.bf16.mxu0 %v3602_v30  ;;  %1266 = vmatprep.subr.bf16.mxu1 %v3724_v9  ;;  %v3748_v30 = vld [vmem:[#allocation5 + $0xf4] ss:$8 sps:$4 sm:$0xff]   ;;  %v3833_v9 = vld [vmem:[#allocation7] sm:$0xff]  }
  0x81   :  { %1464 = vmatpush1.bf16.msra.mxu0 %v3604_v34  ;;  %1267 = vmatpush1.bf16.msra.mxu1 %v3730_v13  ;;  %v3691_v34 = vld [vmem:[#allocation5 + $0x2a0] ss:$8 sps:$4 sm:$0xff]   ;;  %v3803_v13 = vld [vmem:[#allocation2 + $0x184] ss:$24 sps:$4 sm:$0xff]  }
  0x82   :  { %1465 = vmatprep.subr.bf16.mxu0 %v3605_v36  ;;  %1268 = vmatprep.subr.bf16.mxu1 %v3731_v17  ;;  %v3705_v36 = vld [vmem:[#allocation5 + $0x2b4] ss:$8 sps:$4 sm:$0xff]  }
  0x83   :  { %v3809_v17 = vld [vmem:[#allocation2 + $0x1b4] ss:$24 sps:$4 sm:$0xff]  }
  0x85   :  { %1466 = vmatpush1.bf16.msra.mxu0 %v3607_v37  ;;  %1269 = vmatpush1.bf16.msra.mxu1 %v3733_v18  ;;  %v3755_v37 = vld [vmem:[#allocation2] ss:$24 sps:$4 sm:$0xff]   ;;  %v3844_v18 = vld [vmem:[#allocation7 + $0x48] sm:$0xff]  }
  0x86   :  { %1467 = vmatprep.subr.bf16.mxu0 %v3608_v40  ;;  %1270 = vmatprep.subr.bf16.mxu1 %v3736_v20  ;;  %v3717_v40 = vld [vmem:[#allocation5 + $0x2c4] ss:$8 sps:$4 sm:$0xff]   ;;  %v3738_v20 = vld [vmem:[#allocation2 + $0x2a8] ss:$24 sps:$4 sm:$0xff]  }
  0x89   :  { %1468 = vmatpush1.bf16.msra.mxu0 %v3610_v42  ;;  %1271 = vmatpush1.bf16.msra.mxu1 %v3742_v24  ;;  %v3653_v42 = vld [vmem:[#allocation2 + $0x15c] ss:$24 sps:$4 sm:$0xff]   ;;  %v3750_v24 = vld [vmem:[#allocation2 + $0x2d8] ss:$24 sps:$4 sm:$0xff]  }
  0x8a   :  { %1630 = vmatprep.subr.bf16.mxu0 %v3616_v44  ;;  %1272 = vmatprep.subr.bf16.mxu1 %v3743_v27  ;;  %v3729_v44 = vld [vmem:[#allocation5 + $0x2d4] ss:$8 sps:$4 sm:$0xff]  }
  0x8b   :  { %v3821_v27 = vld [vmem:[#allocation2 + $0x214] ss:$24 sps:$4 sm:$0xff]  }
  0x8c   :  { %1470 = vmatmul.mubr.bf16.vlgmr.msra.gmra.mrb[0].mxu0 %v3611_v45  ;;  %v3763_v45 = vld [vmem:[#allocation2 + $0x30] ss:$24 sps:$4 sm:$0xff]  }
  0x8d   :  { %1631 = vmatpush1.bf16.msra.mxu0 %v3614_v47  ;;  %1479 = vmatprep.mubr.bf16.mxu0 %v3617_v48  ;;  %v3767_v47 = vld [vmem:[#allocation2 + $0x64] ss:$24 sps:$4 sm:$0xff]  }
  0x8e   :  { %1632 = vmatprep.subr.bf16.mxu0 %v3622_v49  ;;  %1273 = vmatpush1.bf16.msra.mxu1 %v3745_v28  ;;  %v3741_v48 = vld [vmem:[#allocation5 + $0x2e4] ss:$8 sps:$4 sm:$0xff]   ;;  %v3655_v49 = vld [vmem:[#allocation2 + $0x158] ss:$24 sps:$4 sm:$0xff]  }
  0x8f   :  { %1274 = vmatprep.subr.bf16.mxu1 %v3748_v30  ;;  %v3855_v28 = vld [vmem:[#allocation7 + $0x50] sm:$0xff]   ;;  %v3857_v30 = vld [vmem:[#allocation7 + $0x58] sm:$0xff]  }
  0x91   :  { %1633 = vmatpush1.bf16.msra.mxu0 %v3620_v52  ;;  %v3753_v52 = vld [vmem:[#allocation5 + $0x2f4] ss:$8 sps:$4 sm:$0xff]  }
  0x92   :  { %1634 = vmatprep.subr.bf16.mxu0 %v3628_v54  ;;  %1275 = vmatpush1.bf16.msra.mxu1 %v3754_v35  ;;  %v3773_v54 = vld [vmem:[#allocation2 + $0x94] ss:$24 sps:$4 sm:$0xff]   ;;  %v3823_v35 = vld [vmem:[#allocation2 + $0x210] ss:$24 sps:$4 sm:$0xff]  }
  0x94   :  { %1480 = vmatmul.mubr.bf16.gmra.mrb[4].mxu0 %v3619_v55  ;;  %v3751_v55 = vld [vmem:[#allocation5 + $0x2f0] ss:$8 sps:$4 sm:$0xff]  }
  0x95   :  { %1489 = vmatprep.mubr.bf16.mxu0 %v3623_v56  ;;  %1635 = vmatpush1.bf16.msra.mxu0 %v3626_v58  ;;  %v3666_v56 = vld [vmem:[#allocation2 + $0x188] ss:$24 sps:$4 sm:$0xff]  }
  0x96   :  { %1636 = vmatprep.subr.bf16.mxu0 %v3634_v59  ;;  %1277 = vmatmul.mubr.bf16.vlgmr.msra.gmra.mrb[0].mxu1 %v3755_v37  ;;  %v3775_v58 = vld [vmem:[#allocation2 + $0x90] ss:$24 sps:$4 sm:$0xff]   ;;  %v3779_v59 = vld [vmem:[#allocation2 + $0xc4] ss:$24 sps:$4 sm:$0xff]  }
  0x97   :  { %1286 = vmatprep.mubr.bf16.mxu1 %v3761_v39  ;;  %v3860_v37 = vld [vmem:[#allocation7 + $0x20] sm:$0xff]  }
  0x98   :  { %v3766_v39 = vld [vmem:[#allocation2 + $0x40] ss:$24 sps:$4 sm:$0xff]  }
  0x99   :  { %1637 = vmatpush1.bf16.msra.mxu0 %v3632_v62  ;;  %v3781_v62 = vld [vmem:[#allocation2 + $0xc0] ss:$24 sps:$4 sm:$0xff]  }
  0x9a   :  { %1638 = vmatprep.subr.bf16.mxu0 %v3640_v0  ;;  %v3690_v0 = vld [vmem:[#allocation2 + $0x1e8] ss:$24 sps:$4 sm:$0xff]  }
  0x9c   :  { %1490 = vmatmul.mubr.bf16.gmra.mrb[8].mxu0 %v3625_v1  ;;  %v3698_v1 = vld [vmem:[#allocation2 + $0x21c] ss:$24 sps:$4 sm:$0xff]  }
  0x9d   :  { %1499 = vmatprep.mubr.bf16.mxu0 %v3629_v3  ;;  %1639 = vmatpush1.bf16.msra.mxu0 %v3638_v4  ;;  %v3791_v3 = vld [vmem:[#allocation2 + $0x124] ss:$24 sps:$4 sm:$0xff]   ;;  %v3702_v4 = vld [vmem:[#allocation2 + $0x218] ss:$24 sps:$4 sm:$0xff]  }
  0x9e   :  { %1640 = vmatprep.subr.bf16.mxu0 %v3646_v5  ;;  %1287 = vmatmul.mubr.bf16.gmra.mrb[4].mxu1 %v3763_v45  ;;  %v3710_v5 = vld [vmem:[#allocation2 + $0x24c] ss:$24 sps:$4 sm:$0xff]   ;;  %v3864_v45 = vld [vmem:[#allocation7 + $0x30] sm:$0xff]  }
  0x9f   :  { %1296 = vmatprep.mubr.bf16.mxu1 %v3767_v47  ;;  %v3772_v47 = vld [vmem:[#allocation2 + $0x70] ss:$24 sps:$4 sm:$0xff]  }
  0xa1   :  { %1641 = vmatpush1.bf16.msra.mxu0 %v3644_v8  ;;  %v3830_v8 = vld [vmem:[#allocation7 + $0x40] sm:$0xff]  }
  0xa2   :  { %1642 = vmatprep.subr.bf16.mxu0 %v3652_v11  ;;  %3248 = vmatprep.subr.bf16.mxu1 %v3830_v8  ;;  %v3722_v11 = vld [vmem:[#allocation2 + $0x27c] ss:$24 sps:$4 sm:$0xff]  }
  0xa3   :  { %3249 = vmatpush3.bf16.msra.mxu1 %v3833_v9  ;;  %v3831_v8 = vld [vmem:[#allocation2 + $0x254] ss:$24 sps:$4 sm:$0xff]   ;;  %v3834_v9 = vld [vmem:[#allocation2 + $0x250] ss:$24 sps:$4 sm:$0xff]  }
  0xa4   :  { %1500 = vmatmul.mubr.bf16.gmra.mrb[12].mxu0 %v3631_v10  ;;  %v3714_v10 = vld [vmem:[#allocation2 + $0x248] ss:$24 sps:$4 sm:$0xff]   ;;  %3250 = vmatprep.subr.bf16.mxu1 %v3844_v18 }
  0xa5   :  { %1509 = vmatprep.mubr.bf16.mxu0 %v3635_v12  ;;  %1643 = vmatpush1.bf16.msra.mxu0 %v3650_v15  ;;  %v3799_v12 = vld [vmem:[#allocation2 + $0x150] ss:$24 sps:$4 sm:$0xff]   ;;  %v3734_v15 = vld [vmem:[#allocation2 + $0x2ac] ss:$24 sps:$4 sm:$0xff]  }
  0xa6   :  { %1644 = vmatprep.subr.bf16.mxu0 %v3658_v16  ;;  %1297 = vmatmul.mubr.bf16.gmra.mrb[8].mxu1 %v3769_v53  ;;  %v3805_v16 = vld [vmem:[#allocation2 + $0x180] ss:$24 sps:$4 sm:$0xff]   ;;  %v3782_v53 = vld [vmem:[#allocation2 + $0xd4] ss:$24 sps:$4 sm:$0xff]  }
  0xa7   :  { %1306 = vmatprep.mubr.bf16.mxu1 %v3773_v54  ;;  %v3843_v54 = vld [vmem:[#allocation2 + $0x2a0] ss:$24 sps:$4 sm:$0xff]  }
  0xa9   :  { %1645 = vmatpush1.bf16.msra.mxu0 %v3656_v19  ;;  %v3847_v19 = vld [vmem:[#allocation7 + $0x8] sm:$0xff]  }
  0xaa   :  { %1646 = vmatprep.subr.bf16.mxu0 %v3669_v21  ;;  %3251 = vmatpush3.bf16.msra.mxu1 %v3847_v19  ;;  %v3746_v21 = vld [vmem:[#allocation2 + $0x2dc] ss:$24 sps:$4 sm:$0xff]  }
  0xab   :  { %3252 = vmatprep.subr.bf16.mxu1 %v3855_v28 }
  0xac   :  { %1510 = vmatmul.mubr.bf16.gmra.mrb[16].mxu0 %v3637_v22  ;;  %v3811_v22 = vld [vmem:[#allocation2 + $0x1b0] ss:$24 sps:$4 sm:$0xff]  }
  0xad   :  { %1519 = vmatprep.mubr.bf16.mxu0 %v3641_v23  ;;  %1647 = vmatpush1.bf16.msra.mxu0 %v3667_v25  ;;  %v3815_v23 = vld [vmem:[#allocation2 + $0x1e4] ss:$24 sps:$4 sm:$0xff]   ;;  %v3760_v25 = vld [vmem:[#allocation2 + $0x14] ss:$24 sps:$4 sm:$0xff]  }
  0xae   :  { %1648 = vmatprep.subr.bf16.mxu0 %v3681_v26  ;;  %1307 = vmatmul.mubr.bf16.gmra.mrb[12].mxu1 %v3775_v58  ;;  %v3817_v26 = vld [vmem:[#allocation2 + $0x1e0] ss:$24 sps:$4 sm:$0xff]   ;;  %v3851_v58 = vld [vmem:[#allocation2 + $0x2d0] ss:$24 sps:$4 sm:$0xff]  }
  0xaf   :  { %1316 = vmatprep.mubr.bf16.mxu1 %v3779_v59  ;;  %v3790_v59 = vld [vmem:[#allocation2 + $0x100] ss:$24 sps:$4 sm:$0xff]  }
  0xb1   :  { %1649 = vmatpush1.bf16.msra.mxu0 %v3679_v29  ;;  %v3856_v29 = vld [vmem:[#allocation7 + $0x10] sm:$0xff]  }
  0xb2   :  { %1650 = vmatprep.subr.bf16.mxu0 %v3693_v32  ;;  %3253 = vmatpush3.bf16.msra.mxu1 %v3856_v29  ;;  %v3858_v32 = vld [vmem:[#allocation7 + $0x18] sm:$0xff]  }
  0xb3   :  { %3254 = vmatprep.subr.bf16.mxu1 %v3857_v30 }
  0xb4   :  { %1520 = vmatmul.mubr.bf16.gmra.mrb[20].mxu0 %v3643_v31  ;;  %v3758_v31 = vld [vmem:[#allocation2 + $0x10] ss:$24 sps:$4 sm:$0xff]  }
  0xb5   :  { %1529 = vmatprep.mubr.bf16.mxu0 %v3647_v33  ;;  %1651 = vmatpush1.bf16.msra.mxu0 %v3691_v34  ;;  %v3764_v33 = vld [vmem:[#allocation2 + $0x44] ss:$24 sps:$4 sm:$0xff]  }
  0xb6   :  { %1652 = vmatprep.subr.bf16.mxu0 %v3705_v36  ;;  %1317 = vmatmul.mubr.bf16.gmra.mrb[16].mxu1 %v3781_v62  ;;  %v3859_v34 = vld [vmem:[#allocation7 + $0x60] sm:$0xff]  }
  0xb7   :  { %1326 = vmatprep.mubr.bf16.mxu1 %v3785_v63  ;;  %v3827_v36 = vld [vmem:[#allocation2 + $0x244] ss:$24 sps:$4 sm:$0xff]   ;;  %3255 = vmatpush3.bf16.msra.mxu1 %v3858_v32  ;;  %v3802_v63 = vld [vmem:[#allocation2 + $0x160] ss:$24 sps:$4 sm:$0xff]  }
  0xb8   :  { %3256 = vmatprep.subr.bf16.mxu1 %v3859_v34  ;;  %v3800_v62 = vld [vmem:[#allocation2 + $0x164] ss:$24 sps:$4 sm:$0xff]  }
  0xb9   :  { %1653 = vmatpush1.bf16.msra.mxu0 %v3703_v38  ;;  %v3861_v38 = vld [vmem:[#allocation7 + $0x68] sm:$0xff]  }
  0xba   :  { %1654 = vmatprep.subr.bf16.mxu0 %v3717_v40  ;;  %v3862_v40 = vld [vmem:[#allocation7 + $0x28] sm:$0xff]  }
  0xbb   :  { %3257 = vmatpush3.bf16.msra.mxu1 %v3860_v37 }
  0xbc   :  { %1530 = vmatmul.mubr.bf16.gmra.mrb[24].mxu0 %v3649_v41  ;;  %v3770_v41 = vld [vmem:[#allocation2 + $0x74] ss:$24 sps:$4 sm:$0xff]   ;;  %3258 = vmatprep.subr.bf16.mxu1 %v3861_v38 }
  0xbd   :  { %1539 = vmatprep.mubr.bf16.mxu0 %v3653_v42  ;;  %1655 = vmatpush1.bf16.msra.mxu0 %v3715_v43  ;;  %v3863_v42 = vld [vmem:[#allocation7 + $0x70] sm:$0xff]   ;;  %v3829_v43 = vld [vmem:[#allocation2 + $0x240] ss:$24 sps:$4 sm:$0xff]  }
  0xbe   :  { %1656 = vmatprep.subr.bf16.mxu0 %v3729_v44  ;;  %1327 = vmatmul.mubr.bf16.gmra.mrb[20].mxu1 %v3787_v2  ;;  %v3835_v44 = vld [vmem:[#allocation2 + $0x274] ss:$24 sps:$4 sm:$0xff]   ;;  %v3812_v2 = vld [vmem:[#allocation2 + $0x1c4] ss:$24 sps:$4 sm:$0xff]  }
  0xbf   :  { %1336 = vmatprep.mubr.bf16.mxu1 %v3791_v3  ;;  %3259 = vmatpush3.bf16.msra.mxu1 %v3862_v40  ;;  %v3814_v3 = vld [vmem:[#allocation2 + $0x1c0] ss:$24 sps:$4 sm:$0xff]  }
  0xc0   :  { %3260 = vmatprep.subr.bf16.mxu1 %v3863_v42 }
  0xc1   :  { %1657 = vmatpush1.bf16.msra.mxu0 %v3727_v46  ;;  %v3865_v46 = vld [vmem:[#allocation7 + $0x78] sm:$0xff]  }
  0xc2   :  { %1658 = vmatprep.subr.bf16.mxu0 %v3741_v48  ;;  %v3866_v48 = vld [vmem:[#allocation7 + $0x38] sm:$0xff]  }
  0xc3   :  { %3261 = vmatpush3.bf16.msra.mxu1 %v3864_v45 }
  0xc4   :  { %1540 = vmatmul.mubr.bf16.gmra.mrb[28].mxu0 %v3655_v49  ;;  %v3776_v49 = vld [vmem:[#allocation2 + $0xa4] ss:$24 sps:$4 sm:$0xff]   ;;  %3262 = vmatprep.subr.bf16.mxu1 %v3865_v46 }
  0xc5   :  { %1549 = vmatprep.mubr.bf16.mxu0 %v3662_v50  ;;  %1659 = vmatpush1.bf16.msra.mxu0 %v3739_v51  ;;  %v3837_v50 = vld [vmem:[#allocation2 + $0x270] ss:$24 sps:$4 sm:$0xff]   ;;  %v3841_v51 = vld [vmem:[#allocation2 + $0x2a4] ss:$24 sps:$4 sm:$0xff]  }
  0xc6   :  { %1660 = vmatprep.subr.bf16.mxu0 %v3753_v52  ;;  %1337 = vmatmul.mubr.bf16.gmra.mrb[24].mxu1 %v3793_v6  ;;  %v3778_v52 = vld [vmem:[#allocation2 + $0xa0] ss:$24 sps:$4 sm:$0xff]   ;;  %v3824_v6 = vld [vmem:[#allocation2 + $0x224] ss:$24 sps:$4 sm:$0xff]  }
  0xc7   :  { %1346 = vmatprep.mubr.bf16.mxu1 %v3797_v7  ;;  %3263 = vmatpush3.bf16.msra.mxu1 %v3866_v48  ;;  %v3826_v7 = vld [vmem:[#allocation2 + $0x220] ss:$24 sps:$4 sm:$0xff]  }
  0xc9   :  { %1661 = vmatpush1.bf16.msra.mxu0 %v3751_v55  ;;  %v3849_v55 = vld [vmem:[#allocation2 + $0x2d4] ss:$24 sps:$4 sm:$0xff]  }
  0xcc   :  { %1550 = vmatmul.mubr.bf16.gmra.mrb[32].mxu0 %v3666_v56  ;;  %v3784_v56 = vld [vmem:[#allocation2 + $0xd0] ss:$24 sps:$4 sm:$0xff]  }
  0xcd   :  { %1559 = vmatprep.mubr.bf16.mxu0 %v3674_v57  ;;  %v3788_v57 = vld [vmem:[#allocation2 + $0x104] ss:$24 sps:$4 sm:$0xff]  }
  0xce   :  { %1347 = vmatmul.mubr.bf16.gmra.mrb[28].mxu1 %v3799_v12  ;;  %v3845_v12 = vld [vmem:[#allocation2 + $0x2b4] ss:$24 sps:$4 sm:$0xff]  }
  0xcf   :  { %1356 = vmatprep.mubr.bf16.mxu1 %v3803_v13  ;;  %v3848_v13 = vld [vmem:[#allocation2 + $0x2b0] ss:$24 sps:$4 sm:$0xff]  }
  0xd4   :  { %1560 = vmatmul.mubr.bf16.gmra.mrb[36].mxu0 %v3678_v60  ;;  %v3794_v60 = vld [vmem:[#allocation2 + $0x134] ss:$24 sps:$4 sm:$0xff]  }
  0xd5   :  { %1569 = vmatprep.mubr.bf16.mxu0 %v3686_v61  ;;  %v3796_v61 = vld [vmem:[#allocation2 + $0x130] ss:$24 sps:$4 sm:$0xff]  }
  0xd6   :  { %1357 = vmatmul.mubr.bf16.gmra.mrb[32].mxu1 %v3805_v16 }
  0xd7   :  { %1366 = vmatprep.mubr.bf16.mxu1 %v3809_v17 }
  0xdc   :  { %1570 = vmatmul.mubr.bf16.gmra.mrb[40].mxu0 %v3690_v0  ;;  %v3806_v0 = vld [vmem:[#allocation2 + $0x194] ss:$24 sps:$4 sm:$0xff]  }
  0xdd   :  { %1579 = vmatprep.mubr.bf16.mxu0 %v3698_v1  ;;  %v3808_v1 = vld [vmem:[#allocation2 + $0x190] ss:$24 sps:$4 sm:$0xff]  }
  0xde   :  { %1367 = vmatmul.mubr.bf16.gmra.mrb[36].mxu1 %v3811_v22 }
  0xdf   :  { %1376 = vmatprep.mubr.bf16.mxu1 %v3815_v23 }
  0xe4   :  { %1580 = vmatmul.mubr.bf16.gmra.mrb[44].mxu0 %v3702_v4  ;;  %v3818_v4 = vld [vmem:[#allocation2 + $0x1f4] ss:$24 sps:$4 sm:$0xff]  }
  0xe5   :  { %1589 = vmatprep.mubr.bf16.mxu0 %v3710_v5  ;;  %v3820_v5 = vld [vmem:[#allocation2 + $0x1f0] ss:$24 sps:$4 sm:$0xff]  }
  0xe6   :  { %1377 = vmatmul.mubr.bf16.gmra.mrb[40].mxu1 %v3817_v26 }
  0xe7   :  { %1386 = vmatprep.mubr.bf16.mxu1 %v3821_v27 }
  0xec   :  { %1590 = vmatmul.mubr.bf16.gmra.mrb[48].mxu0 %v3714_v10  ;;  %v3838_v10 = vld [vmem:[#allocation2 + $0x284] ss:$24 sps:$4 sm:$0xff]  }
  0xed   :  { %1599 = vmatprep.mubr.bf16.mxu0 %v3722_v11  ;;  %v3840_v11 = vld [vmem:[#allocation2 + $0x280] ss:$24 sps:$4 sm:$0xff]  }
  0xee   :  { %1387 = vmatmul.mubr.bf16.gmra.mrb[44].mxu1 %v3823_v35 }
  0xef   :  { %1396 = vmatprep.mubr.bf16.mxu1 %v3827_v36 }
  0xf4   :  { %1600 = vmatmul.mubr.bf16.gmra.mrb[52].mxu0 %v3726_v14  ;;  %v3852_v14 = vld [vmem:[#allocation2 + $0x2e4] ss:$24 sps:$4 sm:$0xff]  }
  0xf5   :  { %1609 = vmatprep.mubr.bf16.mxu0 %v3734_v15  ;;  %v3854_v15 = vld [vmem:[#allocation2 + $0x2e0] ss:$24 sps:$4 sm:$0xff]  }
  0xf6   :  { %1397 = vmatmul.mubr.bf16.gmra.mrb[48].mxu1 %v3829_v43 }
  0xf7   :  { %1406 = vmatprep.mubr.bf16.mxu1 %v3835_v44 }
  0xfc   :  { %1610 = vmatmul.mubr.bf16.gmra.mrb[56].mxu0 %v3738_v20 }
  0xfd   :  { %1619 = vmatprep.mubr.bf16.mxu0 %v3746_v21 }
  0xfe   :  { %1407 = vmatmul.mubr.bf16.gmra.mrb[52].mxu1 %v3837_v50  ;;  %v5272_v50 = vlaneseq }
  0xff   :  { %1416 = vmatprep.mubr.bf16.mxu1 %v3841_v51 }
 0x104   :  { %1620 = vmatmul.mubr.bf16.gmra.mrb[60].mxu0 %v3750_v24 }
 0x105   :  { %1662 = vmatprep.mubr.bf16.mxu0 %v3760_v25 }
 0x106   :  { %1417 = vmatmul.mubr.bf16.gmra.mrb[56].mxu1 %v3843_v54 }
 0x107   :  { %1426 = vmatprep.mubr.bf16.mxu1 %v3849_v55 }
 0x10c   :  { %1663 = vmatmul.mubr.bf16.vlgmr.msra.gmra.mrb[0].mxu0 %v3758_v31 }
 0x10d   :  { %1672 = vmatprep.mubr.bf16.mxu0 %v3764_v33 }
 0x10e   :  { %1427 = vmatmul.mubr.bf16.gmra.mrb[60].mxu1 %v3851_v58  ;;  %v272_v58 = vld [vmem:[%s5267_s2] sm:$0x3] }
 0x114   :  { %1673 = vmatmul.mubr.bf16.gmra.mrb[4].mxu0 %v3766_v39 }
 0x115   :  { %1682 = vmatprep.mubr.bf16.mxu0 %v3770_v41 }
 0x11c   :  { %1683 = vmatmul.mubr.bf16.gmra.mrb[8].mxu0 %v3772_v47 }
 0x11d   :  { %1692 = vmatprep.mubr.bf16.mxu0 %v3776_v49 }
 0x124   :  { %1693 = vmatmul.mubr.bf16.gmra.mrb[12].mxu0 %v3778_v52 }
 0x125   :  { %1702 = vmatprep.mubr.bf16.mxu0 %v3782_v53  ;;  %v275_v53 = vshrl.u32 %v5272_v50, 7 }
 0x12c   :  { %1703 = vmatmul.mubr.bf16.gmra.mrb[16].mxu0 %v3784_v56  ;;  %v276_v56 = vsub.s32 0, %v275_v53 }
 0x12d   :  { %1712 = vmatprep.mubr.bf16.mxu0 %v3788_v57 }
 0x134   :  { %1713 = vmatmul.mubr.bf16.gmra.mrb[20].mxu0 %v3790_v59  ;;  %v280_v59 = vsub.s32 1, %v275_v53 }
 0x135   :  { %1722 = vmatprep.mubr.bf16.mxu0 %v3794_v60 }
 0x13c   :  { %1723 = vmatmul.mubr.bf16.gmra.mrb[24].mxu0 %v3796_v61  ;;  %v4292_v61 = vrot.slane %v272_v58, %v276_v56 }
 0x13d   :  { %1732 = vmatprep.mubr.bf16.mxu0 %v3800_v62  ;;  %v4294_v62 = vrot.slane %v272_v58, %v280_v59 }
 0x144   :  { %1733 = vmatmul.mubr.bf16.gmra.mrb[28].mxu0 %v3802_v63 }
 0x145   :  { %1742 = vmatprep.mubr.bf16.mxu0 %v3806_v0 }
 0x14c   :  { %1743 = vmatmul.mubr.bf16.gmra.mrb[32].mxu0 %v3808_v1 }
 0x14d   :  { %1752 = vmatprep.mubr.bf16.mxu0 %v3812_v2 }
 0x154   :  { %1753 = vmatmul.mubr.bf16.gmra.mrb[36].mxu0 %v3814_v3 }
 0x155   :  { %1762 = vmatprep.mubr.bf16.mxu0 %v3818_v4 }
 0x15c   :  { %1763 = vmatmul.mubr.bf16.gmra.mrb[40].mxu0 %v3820_v5 }
 0x15d   :  { %1772 = vmatprep.mubr.bf16.mxu0 %v3824_v6 }
 0x164   :  { %1773 = vmatmul.mubr.bf16.gmra.mrb[44].mxu0 %v3826_v7 }
 0x165   :  { %1782 = vmatprep.mubr.bf16.mxu0 %v3831_v8 }
 0x169   :  { %v1278_v16 = vpop.f32.mrb[0].mxu1 }
 0x16a   :  { %v1280_v17 = vpop.f32.mrb[1].mxu1  ;;  %v1279_v1 = vadd.f32 %v1278_v16, %v4292_v61 }
 0x16b   :  { %v1282_v18 = vpop.f32.mrb[2].mxu1  ;;  %v1281_v3 = vadd.f32 %v1280_v17, %v4294_v62 }
 0x16c   :  { %1783 = vmatmul.mubr.bf16.gmra.mrb[48].mxu0 %v3834_v9  ;;  %v1284_v19 = vpop.f32.mrb[3].mxu1  ;;  %v1283_v6 = vadd.f32 %v1282_v18, %v4292_v61 }
 0x16d   :  { %1792 = vmatprep.mubr.bf16.mxu0 %v3838_v10  ;;  %v1285_v9 = vadd.f32 %v1284_v19, %v4294_v62 }
 0x171   :  { %v4216_v20 = vpop.f32.mrb[4].mxu1 }
 0x172   :  { %v4218_v21 = vpop.f32.mrb[5].mxu1  ;;  %v1289_v56 = vadd.f32 %v4216_v20, %v4292_v61 }
 0x173   :  { %v4220_v22 = vpop.f32.mrb[6].mxu1  ;;  %v1291_v19 = vadd.f32 %v4218_v21, %v4294_v62 }
 0x174   :  { %1793 = vmatmul.mubr.bf16.gmra.mrb[52].mxu0 %v3840_v11  ;;  %v4222_v23 = vpop.f32.mrb[7].mxu1 }
 0x175   :  { %1802 = vmatprep.mubr.bf16.mxu0 %v3845_v12  ;;  %v1295_v20 = vadd.f32 %v4222_v23, %v4294_v62 }
 0x179   :  { %v4224_v24 = vpop.f32.mrb[8].mxu1 }
 0x17a   :  { %v4226_v25 = vpop.f32.mrb[9].mxu1 }
 0x17b   :  { %v4228_v26 = vpop.f32.mrb[10].mxu1 }
 0x17c   :  { %1803 = vmatmul.mubr.bf16.gmra.mrb[56].mxu0 %v3848_v13  ;;  %v4230_v27 = vpop.f32.mrb[11].mxu1 }
 0x17d   :  { %1812 = vmatprep.mubr.bf16.mxu0 %v3852_v14 }
 0x181   :  { %v4232_v28 = vpop.f32.mrb[12].mxu1 }
 0x182   :  { %v4234_v29 = vpop.f32.mrb[13].mxu1 }
 0x183   :  { %v4236_v30 = vpop.f32.mrb[14].mxu1 }
 0x184   :  { %1813 = vmatmul.mubr.bf16.gmra.mrb[60].mxu0 %v3854_v15  ;;  %v4238_v31 = vpop.f32.mrb[15].mxu1 }
 0x189   :  { %v4240_v32 = vpop.f32.mrb[16].mxu1 }
 0x18a   :  { %v4242_v33 = vpop.f32.mrb[17].mxu1 }
 0x18b   :  { %v4244_v34 = vpop.f32.mrb[18].mxu1 }
 0x18c   :  { %v4246_v35 = vpop.f32.mrb[19].mxu1 }
 0x191   :  { %v4248_v36 = vpop.f32.mrb[20].mxu1 }
 0x192   :  { %v4250_v37 = vpop.f32.mrb[21].mxu1 }
 0x193   :  { %v4252_v38 = vpop.f32.mrb[22].mxu1 }
 0x194   :  { %v4254_v39 = vpop.f32.mrb[23].mxu1 }
 0x199   :  { %v4256_v40 = vpop.f32.mrb[24].mxu1 }
 0x19a   :  { %v4258_v41 = vpop.f32.mrb[25].mxu1 }
 0x19b   :  { %v4260_v42 = vpop.f32.mrb[26].mxu1 }
 0x19c   :  { %v4262_v43 = vpop.f32.mrb[27].mxu1 }
 0x1a1   :  { %v4264_v44 = vpop.f32.mrb[28].mxu1 }
 0x1a2   :  { %v4266_v45 = vpop.f32.mrb[29].mxu1 }
 0x1a3   :  { %v4268_v46 = vpop.f32.mrb[30].mxu1 }
 0x1a4   :  { %v4270_v47 = vpop.f32.mrb[31].mxu1 }
 0x1a9   :  { %v4272_v48 = vpop.f32.mrb[32].mxu1 }
 0x1aa   :  { %v4274_v49 = vpop.f32.mrb[33].mxu1 }
 0x1ab   :  { %v4276_v51 = vpop.f32.mrb[34].mxu1 }
 0x1ac   :  { %v4278_v52 = vpop.f32.mrb[35].mxu1 }
 0x1b1   :  { %v4281_v54 = vpop.f32.mrb[36].mxu1 }
 0x1b2   :  { %v4283_v55 = vpop.f32.mrb[37].mxu1 }
 0x1b3   :  { %v4285_v57 = vpop.f32.mrb[38].mxu1 }
 0x1b4   :  { %v4290_v60 = vpop.f32.mrb[39].mxu1 }
 0x1b9   :  { %v4296_v63 = vpop.f32.mrb[40].mxu1 }
 0x1ba   :  { %v4298_v0 = vpop.f32.mrb[41].mxu1 }
 0x1bb   :  { %v4301_v2 = vpop.f32.mrb[42].mxu1 }
 0x1bc   :  { %v4304_v4 = vpop.f32.mrb[43].mxu1 }
 0x1c1   :  { %v4308_v14 = vpop.f32.mrb[44].mxu1 }
 0x1c2   :  { %v4310_v16 = vpop.f32.mrb[45].mxu1 }
 0x1c3   :  { %v4314_v58 = vpop.f32.mrb[46].mxu1 }
 0x1df   :  { %v1664_v5 = vpop.f32.mrb[0].mxu0 }
 0x1e0   :  { %v3361_v7 = vadd.f32 %v1664_v5, %v1279_v1  ;;  %v1666_v8 = vpop.f32.mrb[1].mxu0  ;;  %v4318_v1 = vpop.f32.mrb[47].mxu1 }
 0x1e1   :  { %v3363_v10 = vadd.f32 %v1666_v8, %v1281_v3  ;;  %v1668_v11 = vpop.f32.mrb[2].mxu0  ;;  %v1293_v8 = vadd.f32 %v4220_v22, %v4292_v61  ;;  %v4324_v21 = vpop.f32.mrb[48].mxu1  ;;  %v1299_v22 = vadd.f32 %v4224_v24, %v4292_v61  ;;  %v1305_v24 = vadd.f32 %v4230_v27, %v4294_v62 }
 0x1e2   :  { %v3365_v12 = vadd.f32 %v1668_v11, %v1283_v6  ;;  %v1670_v13 = vpop.f32.mrb[3].mxu0  ;;  %v1823_v53 = vmax.f32 %v3361_v7, 0.0 }
 0x1e3   :  { %v3367_v15 = vadd.f32 %v1670_v13, %v1285_v9  ;;  %v1824_v18 = vmax.f32 %v3363_v10, 0.0 }
 0x1e4   :  { %v1825_v17 = vmax.f32 %v3365_v12, 0.0 }
 0x1e5   :  { %v1826_v59 = vmax.f32 %v3367_v15, 0.0 }
 0x1e6   :  { %v1887_v3 = vpack.c.bf16 %v1825_v17, %v1823_v53  ;;  %v4326_v53 = vpop.f32.mrb[49].mxu1 }
 0x1e7   :  { %v1888_v5 = vpack.c.bf16 %v1826_v59, %v1824_v18  ;;  %v1674_v6 = vpop.f32.mrb[4].mxu0 }
 0x1e8   :  { %v3369_v7 = vadd.f32 %v1674_v6, %v1289_v56  ;;  %v1676_v9 = vpop.f32.mrb[5].mxu0  ;;  %v4330_v56 = vpop.f32.mrb[50].mxu1 }
 0x1e9   :  { %v3371_v11 = vadd.f32 %v1676_v9, %v1291_v19  ;;  %v1678_v12 = vpop.f32.mrb[6].mxu0  ;;  %2086 = vmatprep.mubr.bf16.mxu1 %v1888_v5  ;;  %v1301_v19 = vadd.f32 %v4226_v25, %v4294_v62  ;;  %v4334_v5 = vpop.f32.mrb[51].mxu1  ;;  %v1303_v9 = vadd.f32 %v4228_v26, %v4292_v61  ;;  %v1309_v26 = vadd.f32 %v4232_v28, %v4292_v61 }
 0x1ea   :  { %v3373_v10 = vadd.f32 %v1678_v12, %v1293_v8  ;;  %v1680_v13 = vpop.f32.mrb[7].mxu0  ;;  %2087 = vmatmul.mubr.bf16.vlgmr.msra.gmra.mrb[64].mxu1 %v1887_v3  ;;  %v1827_v17 = vmax.f32 %v3369_v7, 0.0  ;;  %v4340_v25 = vpop.f32.mrb[52].mxu1  ;;  %v1315_v28 = vadd.f32 %v4238_v31, %v4294_v62 }
 0x1eb   :  { %v3375_v15 = vadd.f32 %v1680_v13, %v1295_v20  ;;  %v1828_v59 = vmax.f32 %v3371_v11, 0.0 }
 0x1ec   :  { %v1829_v18 = vmax.f32 %v3373_v10, 0.0 }
 0x1ed   :  { %v1830_v23 = vmax.f32 %v3375_v15, 0.0 }
 0x1ee   :  { %v1889_v3 = vpack.c.bf16 %v1829_v18, %v1827_v17  ;;  %v4342_v17 = vpop.f32.mrb[53].mxu1 }
 0x1ef   :  { %v1890_v6 = vpack.c.bf16 %v1830_v23, %v1828_v59  ;;  %v1684_v8 = vpop.f32.mrb[8].mxu0 }
 0x1f0   :  { %v3377_v7 = vadd.f32 %v1684_v8, %v1299_v22  ;;  %v1686_v20 = vpop.f32.mrb[9].mxu0  ;;  %v4346_v22 = vpop.f32.mrb[54].mxu1 }
 0x1f1   :  { %v3379_v12 = vadd.f32 %v1686_v20, %v1301_v19  ;;  %v1688_v10 = vpop.f32.mrb[10].mxu0  ;;  %2094 = vmatprep.mubr.bf16.mxu1 %v1890_v6  ;;  %v1311_v19 = vadd.f32 %v4234_v29, %v4294_v62  ;;  %v4350_v6 = vpop.f32.mrb[55].mxu1  ;;  %v1313_v20 = vadd.f32 %v4236_v30, %v4292_v61  ;;  %v1319_v30 = vadd.f32 %v4240_v32, %v4292_v61 }
 0x1f2   :  { %v3381_v11 = vadd.f32 %v1688_v10, %v1303_v9  ;;  %v1690_v13 = vpop.f32.mrb[11].mxu0  ;;  %2095 = vmatmul.mubr.bf16.gmra.mrb[68].mxu1 %v1889_v3  ;;  %v1831_v18 = vmax.f32 %v3377_v7, 0.0  ;;  %v4356_v29 = vpop.f32.mrb[56].mxu1  ;;  %v1325_v32 = vadd.f32 %v4246_v35, %v4294_v62 }
 0x1f3   :  { %v3383_v15 = vadd.f32 %v1690_v13, %v1305_v24  ;;  %v1832_v23 = vmax.f32 %v3379_v12, 0.0 }
 0x1f4   :  { %v1833_v59 = vmax.f32 %v3381_v11, 0.0 }
 0x1f5   :  { %v1834_v27 = vmax.f32 %v3383_v15, 0.0 }
 0x1f6   :  { %v1891_v3 = vpack.c.bf16 %v1833_v59, %v1831_v18  ;;  %v4358_v18 = vpop.f32.mrb[57].mxu1 }
 0x1f7   :  { %v1892_v8 = vpack.c.bf16 %v1834_v27, %v1832_v23  ;;  %v1694_v9 = vpop.f32.mrb[12].mxu0 }
 0x1f8   :  { %v3385_v7 = vadd.f32 %v1694_v9, %v1309_v26  ;;  %v1696_v24 = vpop.f32.mrb[13].mxu0  ;;  %v4362_v26 = vpop.f32.mrb[58].mxu1 }
 0x1f9   :  { %v3387_v10 = vadd.f32 %v1696_v24, %v1311_v19  ;;  %v1698_v11 = vpop.f32.mrb[14].mxu0  ;;  %2102 = vmatprep.mubr.bf16.mxu1 %v1892_v8  ;;  %v1321_v19 = vadd.f32 %v4242_v33, %v4294_v62  ;;  %v4366_v8 = vpop.f32.mrb[59].mxu1  ;;  %v1323_v24 = vadd.f32 %v4244_v34, %v4292_v61  ;;  %v1329_v34 = vadd.f32 %v4248_v36, %v4292_v61 }
 0x1fa   :  { %v3389_v12 = vadd.f32 %v1698_v11, %v1313_v20  ;;  %v1700_v13 = vpop.f32.mrb[15].mxu0  ;;  %2103 = vmatmul.mubr.bf16.gmra.mrb[72].mxu1 %v1891_v3  ;;  %v1835_v59 = vmax.f32 %v3385_v7, 0.0  ;;  %v4372_v33 = vpop.f32.mrb[60].mxu1  ;;  %v1335_v36 = vadd.f32 %v4254_v39, %v4294_v62 }
 0x1fb   :  { %v3391_v15 = vadd.f32 %v1700_v13, %v1315_v28  ;;  %v1836_v27 = vmax.f32 %v3387_v10, 0.0 }
 0x1fc   :  { %v1837_v23 = vmax.f32 %v3389_v12, 0.0 }
 0x1fd   :  { %v1838_v31 = vmax.f32 %v3391_v15, 0.0 }
 0x1fe   :  { %v1893_v3 = vpack.c.bf16 %v1837_v23, %v1835_v59  ;;  %v4374_v59 = vpop.f32.mrb[61].mxu1 }
 0x1ff   :  { %v1894_v9 = vpack.c.bf16 %v1838_v31, %v1836_v27  ;;  %v1704_v20 = vpop.f32.mrb[16].mxu0 }
 0x200   :  { %v3393_v7 = vadd.f32 %v1704_v20, %v1319_v30  ;;  %v1706_v28 = vpop.f32.mrb[17].mxu0  ;;  %v4378_v30 = vpop.f32.mrb[62].mxu1 }
 0x201   :  { %v3395_v11 = vadd.f32 %v1706_v28, %v1321_v19  ;;  %v1708_v12 = vpop.f32.mrb[18].mxu0  ;;  %2110 = vmatprep.mubr.bf16.mxu1 %v1894_v9  ;;  %v1331_v19 = vadd.f32 %v4250_v37, %v4294_v62  ;;  %v4382_v9 = vpop.f32.mrb[63].mxu1  ;;  %v1333_v28 = vadd.f32 %v4252_v38, %v4292_v61  ;;  %v1341_v38 = vadd.f32 %v4258_v41, %v4294_v62 }
 0x202   :  { %v3397_v10 = vadd.f32 %v1708_v12, %v1323_v24  ;;  %v1710_v13 = vpop.f32.mrb[19].mxu0  ;;  %2111 = vmatmul.mubr.bf16.gmra.mrb[76].mxu1 %v1893_v3  ;;  %v1839_v23 = vmax.f32 %v3393_v7, 0.0 }
 0x203   :  { %v3399_v15 = vadd.f32 %v1710_v13, %v1325_v32  ;;  %v1840_v31 = vmax.f32 %v3395_v11, 0.0 }
 0x204   :  { %v1841_v27 = vmax.f32 %v3397_v10, 0.0 }
 0x205   :  { %v1842_v35 = vmax.f32 %v3399_v15, 0.0 }
 0x206   :  { %v1895_v3 = vpack.c.bf16 %v1841_v27, %v1839_v23  ;;  %v1339_v23 = vadd.f32 %v4256_v40, %v4292_v61 }
 0x207   :  { %v1896_v20 = vpack.c.bf16 %v1842_v35, %v1840_v31  ;;  %v1714_v24 = vpop.f32.mrb[20].mxu0 }
 0x208   :  { %v3401_v7 = vadd.f32 %v1714_v24, %v1329_v34  ;;  %v1716_v32 = vpop.f32.mrb[21].mxu0 }
 0x209   :  { %v3403_v12 = vadd.f32 %v1716_v32, %v1331_v19  ;;  %v1718_v10 = vpop.f32.mrb[22].mxu0  ;;  %2118 = vmatprep.mubr.bf16.mxu1 %v1896_v20  ;;  %v1343_v19 = vadd.f32 %v4260_v42, %v4292_v61  ;;  %v1351_v42 = vadd.f32 %v4266_v45, %v4294_v62 }
 0x20a   :  { %v3405_v11 = vadd.f32 %v1718_v10, %v1333_v28  ;;  %v1720_v13 = vpop.f32.mrb[23].mxu0  ;;  %2119 = vmatmul.mubr.bf16.gmra.mrb[80].mxu1 %v1895_v3  ;;  %v1843_v15 = vmax.f32 %v3401_v7, 0.0  ;;  %v1345_v3 = vadd.f32 %v4262_v43, %v4294_v62 }
 0x20b   :  { %v3407_v37 = vadd.f32 %v1720_v13, %v1335_v36  ;;  %v1844_v27 = vmax.f32 %v3403_v12, 0.0 }
 0x20c   :  { %v1845_v50 = vmax.f32 %v3405_v11, 0.0 }
 0x20d   :  { %v1846_v31 = vmax.f32 %v3407_v37, 0.0 }
 0x20e   :  { %v1897_v34 = vpack.c.bf16 %v1845_v50, %v1843_v15  ;;  %v1349_v50 = vadd.f32 %v4264_v44, %v4292_v61  ;;  %v1353_v15 = vadd.f32 %v4268_v46, %v4292_v61  ;;  %v1361_v46 = vadd.f32 %v4274_v49, %v4294_v62 }
 0x20f   :  { %v1898_v35 = vpack.c.bf16 %v1846_v31, %v1844_v27  ;;  %v1724_v39 = vpop.f32.mrb[24].mxu0  ;;  %v1355_v31 = vadd.f32 %v4270_v47, %v4294_v62 }
 0x210   :  { %v3409_v20 = vadd.f32 %v1724_v39, %v1339_v23  ;;  %v1726_v24 = vpop.f32.mrb[25].mxu0 }
 0x211   :  { %v3411_v28 = vadd.f32 %v1726_v24, %v1341_v38  ;;  %v1728_v7 = vpop.f32.mrb[26].mxu0  ;;  %2126 = vmatprep.mubr.bf16.mxu1 %v1898_v35 }
 0x212   :  { %v3413_v40 = vadd.f32 %v1728_v7, %v1343_v19  ;;  %v1730_v32 = vpop.f32.mrb[27].mxu0  ;;  %2127 = vmatmul.mubr.bf16.gmra.mrb[84].mxu1 %v1897_v34  ;;  %v1847_v12 = vmax.f32 %v3409_v20, 0.0  ;;  %v1359_v20 = vadd.f32 %v4272_v48, %v4292_v61 }
 0x213   :  { %v3415_v36 = vadd.f32 %v1730_v32, %v1345_v3  ;;  %v1848_v10 = vmax.f32 %v3411_v28, 0.0 }
 0x214   :  { %v1849_v41 = vmax.f32 %v3413_v40, 0.0  ;;  %v1363_v40 = vadd.f32 %v4276_v51, %v4292_v61  ;;  %v1371_v51 = vadd.f32 %v4283_v55, %v4294_v62 }
 0x215   :  { %v1850_v11 = vmax.f32 %v3415_v36, 0.0 }
 0x216   :  { %v1899_v13 = vpack.c.bf16 %v1849_v41, %v1847_v12  ;;  %v1365_v12 = vadd.f32 %v4278_v52, %v4294_v62 }
 0x217   :  { %v1900_v37 = vpack.c.bf16 %v1850_v11, %v1848_v10  ;;  %v1734_v43 = vpop.f32.mrb[28].mxu0 }
 0x218   :  { %v3417_v23 = vadd.f32 %v1734_v43, %v1349_v50  ;;  %v1736_v27 = vpop.f32.mrb[29].mxu0 }
 0x219   :  { %v3419_v38 = vadd.f32 %v1736_v27, %v1351_v42  ;;  %v1738_v34 = vpop.f32.mrb[30].mxu0  ;;  %2134 = vmatprep.mubr.bf16.mxu1 %v1900_v37  ;;  %v1373_v27 = vadd.f32 %v4285_v57, %v4292_v61  ;;  %v1381_v57 = vadd.f32 %v4298_v0, %v4294_v62 }
 0x21a   :  { %v3421_v44 = vadd.f32 %v1738_v34, %v1353_v15  ;;  %v1740_v35 = vpop.f32.mrb[31].mxu0  ;;  %2135 = vmatmul.mubr.bf16.gmra.mrb[88].mxu1 %v1899_v13  ;;  %v1851_v19 = vmax.f32 %v3417_v23, 0.0  ;;  %v1369_v13 = vadd.f32 %v4281_v54, %v4292_v61  ;;  %v1375_v34 = vadd.f32 %v4290_v60, %v4294_v62 }
 0x21b   :  { %v3423_v39 = vadd.f32 %v1740_v35, %v1355_v31  ;;  %v1852_v24 = vmax.f32 %v3419_v38, 0.0 }
 0x21c   :  { %v1853_v45 = vmax.f32 %v3421_v44, 0.0 }
 0x21d   :  { %v1854_v3 = vmax.f32 %v3423_v39, 0.0 }
 0x21e   :  { %v1901_v28 = vpack.c.bf16 %v1853_v45, %v1851_v19 }
 0x21f   :  { %v1902_v7 = vpack.c.bf16 %v1854_v3, %v1852_v24  ;;  %v1744_v47 = vpop.f32.mrb[32].mxu0 }
 0x220   :  { %v3425_v32 = vadd.f32 %v1744_v47, %v1359_v20  ;;  %v1746_v36 = vpop.f32.mrb[33].mxu0  ;;  %v1379_v20 = vadd.f32 %v4296_v63, %v4292_v61 }
 0x221   :  { %v3427_v41 = vadd.f32 %v1746_v36, %v1361_v46  ;;  %v1748_v50 = vpop.f32.mrb[34].mxu0  ;;  %2142 = vmatprep.mubr.bf16.mxu1 %v1902_v7  ;;  %v1383_v7 = vadd.f32 %v4301_v2, %v4292_v61  ;;  %v1391_v2 = vadd.f32 %v4310_v16, %v4294_v62 }
 0x222   :  { %v3429_v48 = vadd.f32 %v1748_v50, %v1363_v40  ;;  %v1750_v10 = vpop.f32.mrb[35].mxu0  ;;  %2143 = vmatmul.mubr.bf16.gmra.mrb[92].mxu1 %v1901_v28  ;;  %v1855_v42 = vmax.f32 %v3425_v32, 0.0  ;;  %v1385_v32 = vadd.f32 %v4304_v4, %v4294_v62 }
 0x223   :  { %v3431_v11 = vadd.f32 %v1750_v10, %v1365_v12  ;;  %v1856_v37 = vmax.f32 %v3427_v41, 0.0  ;;  %v1389_v10 = vadd.f32 %v4308_v14, %v4292_v61 }
 0x224   :  { %v1857_v49 = vmax.f32 %v3429_v48, 0.0 }
 0x225   :  { %v1858_v43 = vmax.f32 %v3431_v11, 0.0 }
 0x226   :  { %v1903_v15 = vpack.c.bf16 %v1857_v49, %v1855_v42 }
 0x227   :  { %v1904_v23 = vpack.c.bf16 %v1858_v43, %v1856_v37  ;;  %v1754_v52 = vpop.f32.mrb[36].mxu0  ;;  %v1393_v37 = vadd.f32 %v4314_v58, %v4292_v61  ;;  %v1401_v58 = vadd.f32 %v4326_v53, %v4294_v62 }
 0x228   :  { %v3433_v31 = vadd.f32 %v1754_v52, %v1369_v13  ;;  %v1756_v38 = vpop.f32.mrb[37].mxu0 }
 0x229   :  { %v3435_v44 = vadd.f32 %v1756_v38, %v1371_v51  ;;  %v1758_v35 = vpop.f32.mrb[38].mxu0  ;;  %2150 = vmatprep.mubr.bf16.mxu1 %v1904_v23 }
 0x22a   :  { %v3437_v54 = vadd.f32 %v1758_v35, %v1373_v27  ;;  %v1760_v39 = vpop.f32.mrb[39].mxu0  ;;  %2151 = vmatmul.mubr.bf16.gmra.mrb[96].mxu1 %v1903_v15  ;;  %v1859_v45 = vmax.f32 %v3433_v31, 0.0  ;;  %v1395_v15 = vadd.f32 %v4318_v1, %v4294_v62 }
 0x22b   :  { %v3439_v19 = vadd.f32 %v1760_v39, %v1375_v34  ;;  %v1860_v24 = vmax.f32 %v3435_v44, 0.0  ;;  %v1399_v34 = vadd.f32 %v4324_v21, %v4292_v61 }
 0x22c   :  { %v1861_v55 = vmax.f32 %v3437_v54, 0.0 }
 0x22d   :  { %v1862_v3 = vmax.f32 %v3439_v19, 0.0  ;;  %v1403_v19 = vadd.f32 %v4330_v56, %v4292_v61  ;;  %v1411_v56 = vadd.f32 %v4342_v17, %v4294_v62 }
 0x22e   :  { %v1905_v46 = vpack.c.bf16 %v1861_v55, %v1859_v45 }
 0x22f   :  { %v1906_v28 = vpack.c.bf16 %v1862_v3, %v1860_v24  ;;  %v1764_v60 = vpop.f32.mrb[40].mxu0 }
 0x230   :  { %v3441_v47 = vadd.f32 %v1764_v60, %v1379_v20  ;;  %v1766_v40 = vpop.f32.mrb[41].mxu0  ;;  %v1405_v20 = vadd.f32 %v4334_v5, %v4294_v62  ;;  %v1409_v60 = vadd.f32 %v4340_v25, %v4292_v61 }
 0x231   :  { %v3443_v36 = vadd.f32 %v1766_v40, %v1381_v57  ;;  %v1768_v12 = vpop.f32.mrb[42].mxu0  ;;  %2158 = vmatprep.mubr.bf16.mxu1 %v1906_v28 }
 0x232   :  { %v3445_v63 = vadd.f32 %v1768_v12, %v1383_v7  ;;  %v1770_v41 = vpop.f32.mrb[43].mxu0  ;;  %2159 = vmatmul.mubr.bf16.gmra.mrb[100].mxu1 %v1905_v46  ;;  %v1863_v48 = vmax.f32 %v3441_v47, 0.0 }
 0x233   :  { %v3447_v50 = vadd.f32 %v1770_v41, %v1385_v32  ;;  %v1864_v11 = vmax.f32 %v3443_v36, 0.0  ;;  %v1413_v36 = vadd.f32 %v4346_v22, %v4292_v61  ;;  %v1415_v41 = vadd.f32 %v4350_v6, %v4294_v62 }
 0x234   :  { %v1865_v0 = vmax.f32 %v3445_v63, 0.0  ;;  %v1421_v22 = vadd.f32 %v4358_v18, %v4294_v62 }
 0x235   :  { %v1866_v42 = vmax.f32 %v3447_v50, 0.0 }
 0x236   :  { %v1907_v49 = vpack.c.bf16 %v1865_v0, %v1863_v48 }
 0x237   :  { %v1908_v13 = vpack.c.bf16 %v1866_v42, %v1864_v11  ;;  %v1774_v4 = vpop.f32.mrb[44].mxu0  ;;  %v1419_v42 = vadd.f32 %v4356_v29, %v4292_v61 }
 0x238   :  { %v3449_v43 = vadd.f32 %v1774_v4, %v1389_v10  ;;  %v1776_v51 = vpop.f32.mrb[45].mxu0 }
 0x239   :  { %v3451_v23 = vadd.f32 %v1776_v51, %v1391_v2  ;;  %v1778_v52 = vpop.f32.mrb[46].mxu0  ;;  %2166 = vmatprep.mubr.bf16.mxu1 %v1908_v13 }
 0x23a   :  { %v3453_v14 = vadd.f32 %v1778_v52, %v1393_v37  ;;  %v1780_v27 = vpop.f32.mrb[47].mxu0  ;;  %2167 = vmatmul.mubr.bf16.gmra.mrb[104].mxu1 %v1907_v49  ;;  %v1867_v38 = vmax.f32 %v3449_v43, 0.0  ;;  %v1423_v37 = vadd.f32 %v4362_v26, %v4292_v61  ;;  %v1431_v26 = vadd.f32 %v4374_v59, %v4294_v62 }
 0x23b   :  { %v3455_v31 = vadd.f32 %v1780_v27, %v1395_v15  ;;  %v1868_v44 = vmax.f32 %v3451_v23, 0.0  ;;  %v1425_v15 = vadd.f32 %v4366_v8, %v4294_v62 }
 0x23c   :  { %v1869_v16 = vmax.f32 %v3453_v14, 0.0 }
 0x23d   :  { %v1870_v35 = vmax.f32 %v3455_v31, 0.0 }
 0x23e   :  { %v1909_v54 = vpack.c.bf16 %v1869_v16, %v1867_v38  ;;  %v1429_v38 = vadd.f32 %v4372_v33, %v4292_v61 }
 0x23f   :  { %v1910_v39 = vpack.c.bf16 %v1870_v35, %v1868_v44  ;;  %v1784_v1 = vpop.f32.mrb[48].mxu0 }
 0x240   :  { %v3457_v45 = vadd.f32 %v1784_v1, %v1399_v34  ;;  %v1786_v55 = vpop.f32.mrb[49].mxu0  ;;  %v1435_v1 = vadd.f32 %v4382_v9, %v4294_v62  ;;  %v4471_v62 = vld [vmem:[%s5269_s4] ss:$0 sm:$0xff] }
 0x241   :  { %v3459_v24 = vadd.f32 %v1786_v55, %v1401_v58  ;;  %v1788_v3 = vpop.f32.mrb[50].mxu0  ;;  %2174 = vmatprep.mubr.bf16.mxu1 %v1910_v39  ;;  %v1433_v58 = vadd.f32 %v4378_v30, %v4292_v61 }
 0x242   :  { %v3461_v21 = vadd.f32 %v1788_v3, %v1403_v19  ;;  %v1790_v57 = vpop.f32.mrb[51].mxu0  ;;  %2175 = vmatmul.mubr.bf16.gmra.mrb[108].mxu1 %v1909_v54  ;;  %v1871_v28 = vmax.f32 %v3457_v45, 0.0 }
 0x243   :  { %v3463_v46 = vadd.f32 %v1790_v57, %v1405_v20  ;;  %v1872_v7 = vmax.f32 %v3459_v24, 0.0 }
 0x244   :  { %v1873_v53 = vmax.f32 %v3461_v21, 0.0 }
 0x245   :  { %v1874_v47 = vmax.f32 %v3463_v46, 0.0 }
 0x246   :  { %v1911_v40 = vpack.c.bf16 %v1873_v53, %v1871_v28 }
 0x247   :  { %v1912_v32 = vpack.c.bf16 %v1874_v47, %v1872_v7  ;;  %v1794_v5 = vpop.f32.mrb[52].mxu0 }
 0x248   :  { %v3465_v12 = vadd.f32 %v1794_v5, %v1409_v60  ;;  %v1796_v63 = vpop.f32.mrb[53].mxu0 }
 0x249   :  { %v3467_v50 = vadd.f32 %v1796_v63, %v1411_v56  ;;  %v1798_v48 = vpop.f32.mrb[54].mxu0  ;;  %2182 = vmatprep.mubr.bf16.mxu1 %v1912_v32 }
 0x24a   :  { %v3469_v25 = vadd.f32 %v1798_v48, %v1413_v36  ;;  %v1800_v0 = vpop.f32.mrb[55].mxu0  ;;  %2183 = vmatmul.mubr.bf16.gmra.mrb[112].mxu1 %v1911_v40  ;;  %v1875_v11 = vmax.f32 %v3465_v12, 0.0 }
 0x24b   :  { %v3471_v10 = vadd.f32 %v1800_v0, %v1415_v41  ;;  %v1876_v2 = vmax.f32 %v3467_v50, 0.0 }
 0x24c   :  { %v1877_v17 = vmax.f32 %v3469_v25, 0.0 }
 0x24d   :  { %v1878_v49 = vmax.f32 %v3471_v10, 0.0 }
 0x24e   :  { %v1913_v13 = vpack.c.bf16 %v1877_v17, %v1875_v11 }
 0x24f   :  { %v1914_v4 = vpack.c.bf16 %v1878_v49, %v1876_v2  ;;  %v1804_v6 = vpop.f32.mrb[56].mxu0 }
 0x250   :  { %v3473_v43 = vadd.f32 %v1804_v6, %v1419_v42  ;;  %v1806_v51 = vpop.f32.mrb[57].mxu0 }
 0x251   :  { %v3475_v23 = vadd.f32 %v1806_v51, %v1421_v22  ;;  %v1808_v52 = vpop.f32.mrb[58].mxu0  ;;  %2190 = vmatprep.mubr.bf16.mxu1 %v1914_v4 }
 0x252   :  { %v3477_v29 = vadd.f32 %v1808_v52, %v1423_v37  ;;  %v1810_v14 = vpop.f32.mrb[59].mxu0  ;;  %2191 = vmatmul.mubr.bf16.gmra.mrb[116].mxu1 %v1913_v13  ;;  %v1879_v31 = vmax.f32 %v3473_v43, 0.0 }
 0x253   :  { %v3479_v27 = vadd.f32 %v1810_v14, %v1425_v15  ;;  %v1880_v16 = vmax.f32 %v3475_v23, 0.0 }
 0x254   :  { %v1881_v18 = vmax.f32 %v3477_v29, 0.0 }
 0x255   :  { %v1882_v34 = vmax.f32 %v3479_v27, 0.0 }
 0x256   :  { %v1915_v44 = vpack.c.bf16 %v1881_v18, %v1879_v31 }
 0x257   :  { %v1916_v35 = vpack.c.bf16 %v1882_v34, %v1880_v16  ;;  %v1814_v8 = vpop.f32.mrb[60].mxu0 }
 0x258   :  { %v3481_v54 = vadd.f32 %v1814_v8, %v1429_v38  ;;  %v1816_v39 = vpop.f32.mrb[61].mxu0 }
 0x259   :  { %v3483_v19 = vadd.f32 %v1816_v39, %v1431_v26  ;;  %v1818_v45 = vpop.f32.mrb[62].mxu0  ;;  %2198 = vmatprep.mubr.bf16.mxu1 %v1916_v35  ;;  %v5273_v39 = vlaneseq }
 0x25a   :  { %v3485_v33 = vadd.f32 %v1818_v45, %v1433_v58  ;;  %v1820_v55 = vpop.f32.mrb[63].mxu0  ;;  %2199 = vmatmul.mubr.bf16.gmra.mrb[120].mxu1 %v1915_v44  ;;  %v1883_v24 = vmax.f32 %v3481_v54, 0.0 }
 0x25b   :  { %v3487_v20 = vadd.f32 %v1820_v55, %v1435_v1  ;;  %v1884_v3 = vmax.f32 %v3483_v19, 0.0  ;;  %v4504_v1 = vand.u32 127, %v5273_v39 }
 0x25c   :  { %v1885_v59 = vmax.f32 %v3485_v33, 0.0 }
 0x25d   :  { %v1886_v21 = vmax.f32 %v3487_v20, 0.0  ;;  %vm2729_vm0 = vcmp.ge.s32.totalorder %v4504_v1, 64  ;;  %vm2730_vm1 = vcmp.lt.s32.totalorder %v4504_v1, 96 }
 0x25e   :  { %v1917_v57 = vpack.c.bf16 %v1885_v59, %v1883_v24  ;;  %vm4559_vm5 = vmand %vm2729_vm0, %vm2730_vm1 }
 0x25f   :  { %v1918_v46 = vpack.c.bf16 %v1886_v21, %v1884_v3 }
 0x261   :  { %2206 = vmatprep.mubr.bf16.mxu1 %v1918_v46 }
 0x262   :  { %2207 = vmatmul.mubr.bf16.gmra.mrb[124].mxu1 %v1917_v57 }
 0x2bd   :  { %v3264_v61 = vpop.f32.mrb[64].mxu1 }
 0x2be   :  { %v3265_v30 = vpop.f32.mrb[65].mxu1 }
 0x2bf   :  { %v3266_v9 = vadd.f32 %v3265_v30, %v3264_v61  ;;  %v3267_v28 = vpop.f32.mrb[66].mxu1 }
 0x2c0   :  { %v3268_v53 = vpop.f32.mrb[67].mxu1 }
 0x2c1   :  { %v4474_v60 = vadd.f32 %v3266_v9, %v4471_v62  ;;  %v3269_v7 = vadd.f32 %v3268_v53, %v3267_v28 }
 0x2c3   :  { %v2249_v47 = vand.u32 2147483647, %v4474_v60  ;;  %v4478_v56 = vadd.f32 %v3269_v7, %v4471_v62  ;;  %v2217_v21 = vmax.f32 %v4474_v60, 0.0 }
 0x2c5   :  { %v2281_v40 = vsub.f32 0.0, %v2249_v47  ;;  %v2250_v32 = vand.u32 2147483647, %v4478_v56  ;;  %v3270_v5 = vpop.f32.mrb[68].mxu1  ;;  %v2218_v57 = vmax.f32 %v4478_v56, 0.0 }
 0x2c6   :  { %v3271_v36 = vpop.f32.mrb[69].mxu1 }
 0x2c7   :  { %v2313_v12 = vmul.f32 1.442695, %v2281_v40  ;;  %v2282_v63 = vsub.f32 0.0, %v2250_v32  ;;  %v3272_v41 = vadd.f32 %v3271_v36, %v3270_v5  ;;  %v3273_v50 = vpop.f32.mrb[70].mxu1 }
 0x2c8   :  { %v3274_v48 = vpop.f32.mrb[71].mxu1 }
 0x2c9   :  { %3867 = vpow2.f32 %v2313_v12  ;;  %v2315_v25 = vmul.f32 1.442695, %v2282_v63  ;;  %v4482_v0 = vadd.f32 %v3272_v41, %v4471_v62  ;;  %v3275_v10 = vadd.f32 %v3274_v48, %v3273_v50 }
 0x2cb   :  { %3869 = vpow2.f32 %v2315_v25  ;;  %v2251_v11 = vand.u32 2147483647, %v4482_v0  ;;  %v4486_v17 = vadd.f32 %v3275_v10, %v4471_v62  ;;  %v2219_v30 = vmax.f32 %v4482_v0, 0.0 }
 0x2cd   :  { %v2283_v42 = vsub.f32 0.0, %v2251_v11  ;;  %v2252_v2 = vand.u32 2147483647, %v4486_v17  ;;  %v3276_v49 = vpop.f32.mrb[72].mxu1  ;;  %v2220_v9 = vmax.f32 %v4486_v17, 0.0 }
 0x2ce   :  { %v3277_v22 = vpop.f32.mrb[73].mxu1 }
 0x2cf   :  { %v2317_v13 = vmul.f32 1.442695, %v2283_v42  ;;  %v2284_v4 = vsub.f32 0.0, %v2252_v2  ;;  %v3278_v6 = vadd.f32 %v3277_v22, %v3276_v49  ;;  %v3279_v37 = vpop.f32.mrb[74].mxu1 }
 0x2d0   :  { %v3280_v43 = vpop.f32.mrb[75].mxu1 }
 0x2d1   :  { %3871 = vpow2.f32 %v2317_v13  ;;  %v2319_v51 = vmul.f32 1.442695, %v2284_v4  ;;  %v4490_v15 = vadd.f32 %v3278_v6, %v4471_v62  ;;  %v3281_v23 = vadd.f32 %v3280_v43, %v3279_v37 }
 0x2d3   :  { %v4492_v52 = vpop.eup %3867  ;;  %3873 = vpow2.f32 %v2319_v51  ;;  %v2253_v29 = vand.u32 2147483647, %v4490_v15  ;;  %v4496_v14 = vadd.f32 %v3281_v23, %v4471_v62  ;;  %v2221_v36 = vmax.f32 %v4490_v15, 0.0 }
 0x2d4   :  { %v2377_v27 = vadd.f32 1.0, %v4492_v52  ;;  %v2380_v55 = vmul.f32 -0.5, %v4492_v52  ;;  %v2383_v32 = vand.u32 2147483647, %v4492_v52 }
 0x2d5   :  { %v4499_v31 = vpop.eup %3869  ;;  %v2285_v18 = vsub.f32 0.0, %v2253_v29  ;;  %v2254_v38 = vand.u32 2147483647, %v4496_v14  ;;  %v3282_v16 = vpop.f32.mrb[76].mxu1  ;;  %v2222_v25 = vmax.f32 %v4496_v14, 0.0 }
 0x2d6   :  { %v3283_v34 = vpop.f32.mrb[77].mxu1  ;;  %3875 = vlog2.f32 %v2377_v27  ;;  %v2386_v26 = vadd.f32 1.0, %v4499_v31  ;;  %v2389_v3 = vmul.f32 -0.5, %v4499_v31  ;;  %v2381_v40 = vadd.f32 1.0, %v2380_v55 }
 0x2d7   :  { %v2321_v44 = vmul.f32 1.442695, %v2285_v18  ;;  %v2286_v35 = vsub.f32 0.0, %v2254_v38  ;;  %v3284_v8 = vadd.f32 %v3283_v34, %v3282_v16  ;;  %v3285_v58 = vpop.f32.mrb[78].mxu1  ;;  %v2392_v11 = vand.u32 2147483647, %v4499_v31 }
 0x2d8   :  { %v3286_v54 = vpop.f32.mrb[79].mxu1  ;;  %3877 = vlog2.f32 %v2386_v26  ;;  %v2390_v50 = vadd.f32 1.0, %v2389_v3  ;;  %v2382_v6 = vmul.f32 %v4492_v52, %v2381_v40  ;;  %vm2384_vm2 = vcmp.lt.f32.partialorder %v2383_v32, 0.0004427343  ;;  %v2899_v3 = vld [vmem:[#allocation8 + $0x38] sm:$0xff] }
 0x2d9   :  { %3879 = vpow2.f32 %v2321_v44  ;;  %v2323_v19 = vmul.f32 1.442695, %v2286_v35  ;;  %v4507_v45 = vadd.f32 %v3284_v8, %v4471_v62  ;;  %v3287_v33 = vadd.f32 %v3286_v54, %v3285_v58 }
 0x2da   :  { %v2391_v29 = vmul.f32 %v4499_v31, %v2390_v50  ;;  %vm2393_vm3 = vcmp.lt.f32.partialorder %v2392_v11, 0.0004427343 }
 0x2db   :  { %v4510_v20 = vpop.eup %3871  ;;  %3881 = vpow2.f32 %v2323_v19  ;;  %v2255_v24 = vand.u32 2147483647, %v4507_v45  ;;  %v4514_v59 = vadd.f32 %v3287_v33, %v4471_v62 }
 0x2dc   :  { %v2395_v46 = vadd.f32 1.0, %v4510_v20  ;;  %v2398_v42 = vmul.f32 -0.5, %v4510_v20  ;;  %v2401_v37 = vand.u32 2147483647, %v4510_v20 }
 0x2dd   :  { %v4522_v61 = vpop.eup %3873  ;;  %v2287_v28 = vsub.f32 0.0, %v2255_v24  ;;  %v2256_v53 = vand.u32 2147483647, %v4514_v59  ;;  %v3288_v7 = vpop.f32.mrb[80].mxu1 }
 0x2de   :  { %v3289_v47 = vpop.f32.mrb[81].mxu1  ;;  %3883 = vlog2.f32 %v2395_v46  ;;  %v2404_v5 = vadd.f32 1.0, %v4522_v61  ;;  %v2407_v27 = vmul.f32 -0.5, %v4522_v61  ;;  %v2399_v16 = vadd.f32 1.0, %v2398_v42 }
 0x2df   :  { %v2325_v12 = vmul.f32 1.442695, %v2287_v28  ;;  %v3290_v63 = vadd.f32 %v3289_v47, %v3288_v7  ;;  %v3291_v41 = vpop.f32.mrb[82].mxu1  ;;  %v2288_v2 = vsub.f32 0.0, %v2256_v53  ;;  %vm4549_vm4 = vcmp.lt.f32.partialorder %v2401_v37, 0.0004427343 }
 0x2e0   :  { %v3876_v48 = vpop.eup %3875  ;;  %v3292_v10 = vpop.f32.mrb[83].mxu1  ;;  %3885 = vlog2.f32 %v2404_v5  ;;  %v2410_v31 = vand.u32 2147483647, %v4522_v61  ;;  %v2400_v7 = vmul.f32 %v4510_v20, %v2399_v16 }
 0x2e1   :  { %3887 = vpow2.f32 %v2325_v12  ;;  %v4534_v49 = vadd.f32 %v3290_v63, %v4471_v62  ;;  %v3293_v22 = vadd.f32 %v3292_v10, %v3291_v41  ;;  %v2379_v4 = vmul.f32 0.6931472, %v3876_v48 }
 0x2e2   :  { %v3878_v13 = vpop.eup %3877  ;;  %v2327_v26 = vmul.f32 1.442695, %v2288_v2  ;;  %vm4576_vm6 = vcmp.lt.f32.partialorder %v2410_v31, 0.0004427343 }
 0x2e3   :  { %v4538_v43 = vpop.eup %3879  ;;  %v2257_v51 = vand.u32 2147483647, %v4534_v49  ;;  %v4542_v23 = vadd.f32 %v3293_v22, %v4471_v62  ;;  %v2385_v18 = vsel %vm2384_vm2, %v2382_v6, %v2379_v4  ;;  %v2388_v38 = vmul.f32 0.6931472, %v3878_v13 }
 0x2e4   :  { %v2413_v34 = vadd.f32 1.0, %v4538_v43  ;;  %v2665_v8 = vadd.f32 %v2385_v18, %v2217_v21  ;;  %v2408_v21 = vadd.f32 1.0, %v2407_v27  ;;  %v2416_v47 = vmul.f32 -0.5, %v4538_v43 }
 0x2e5   :  { %v4547_v52 = vpop.eup %3881  ;;  %v2289_v44 = vsub.f32 0.0, %v2257_v51  ;;  %v3294_v35 = vpop.f32.mrb[84].mxu1  ;;  %v2394_v54 = vsel %vm2393_vm3, %v2391_v29, %v2388_v38  ;;  %v2258_v19 = vand.u32 2147483647, %v4542_v23  ;;  %v2419_v37 = vand.u32 2147483647, %v4538_v43 }
 0x2e6   :  { %v3295_v58 = vpop.f32.mrb[85].mxu1  ;;  %3889 = vlog2.f32 %v2413_v34  ;;  %v2697_v24 = vadd.f32 0.0001, %v2665_v8  ;;  %v2666_v53 = vadd.f32 %v2394_v54, %v2218_v57  ;;  %v2422_v40 = vadd.f32 1.0, %v4547_v52 }
 0x2e7   :  { %v3296_v33 = vadd.f32 %v3295_v58, %v3294_v35  ;;  %v3297_v55 = vpop.f32.mrb[86].mxu1  ;;  %3891 = vpow2.f32 %v2327_v26  ;;  %v2329_v32 = vmul.f32 1.442695, %v2289_v44  ;;  %v2290_v48 = vsub.f32 0.0, %v2258_v19 }
 0x2e8   :  { %v3884_v46 = vpop.eup %3883  ;;  %v3298_v28 = vpop.f32.mrb[87].mxu1  ;;  %v4574_v63 = vsel %vm4559_vm5, %v2697_v24, %v4474_v60  ;;  %v2698_v41 = vadd.f32 0.0001, %v2666_v53  ;;  %v2409_v60 = vmul.f32 %v4522_v61, %v2408_v21  ;;  %v2417_v22 = vadd.f32 1.0, %v2416_v47 }
 0x2e9   :  { %v4569_v1 = vadd.f32 %v3296_v33, %v4471_v62  ;;  %v3299_v5 = vadd.f32 %v3298_v28, %v3297_v55  ;;  %v2397_v57 = vmul.f32 0.6931472, %v3884_v46  ;;  %2796 = vrot.lane.b32.xlu0 %v4574_v63, %s4121_s0  ;;  %3893 = vlog2.f32 %v2422_v40 }
 0x2ea   :  { %v3886_v12 = vpop.eup %3885  ;;  %3895 = vpow2.f32 %v2329_v32  ;;  %v4598_v61 = vsel %vm4559_vm5, %v2698_v41, %v4478_v56  ;;  %v2331_v38 = vmul.f32 1.442695, %v2290_v48  ;;  %v2425_v26 = vmul.f32 -0.5, %v4547_v52 }
 0x2eb   :  { %v4580_v50 = vpop.eup %3887  ;;  %v2259_v10 = vand.u32 2147483647, %v4569_v1  ;;  %v4584_v11 = vadd.f32 %v3299_v5, %v4471_v62  ;;  %v2403_v42 = vsel %vm4549_vm4, %v2400_v7, %v2397_v57  ;;  %v2406_v2 = vmul.f32 0.6931472, %v3886_v12 }
 0x2ec   :  { %v2667_v6 = vadd.f32 %v2403_v42, %v2219_v30  ;;  %v2431_v18 = vadd.f32 1.0, %v4580_v50  ;;  %v2223_v35 = vmax.f32 %v4507_v45, 0.0  ;;  %v2418_v58 = vmul.f32 %v4538_v43, %v2417_v22 }
 0x2ed   :  { %v2291_v13 = vsub.f32 0.0, %v2259_v10  ;;  %v3300_v4 = vpop.f32.mrb[88].mxu1  ;;  %v2260_v51 = vand.u32 2147483647, %v4584_v11  ;;  %v2412_v27 = vsel %vm4576_vm6, %v2409_v60, %v2406_v2  ;;  %2798 = vrot.lane.b32.xlu0 %v4598_v61, %s4121_s0  ;;  %v2428_v19 = vand.u32 2147483647, %v4547_v52 }
 0x2ee   :  { %v3301_v29 = vpop.f32.mrb[89].mxu1  ;;  %v2699_v34 = vadd.f32 0.0001, %v2667_v6  ;;  %v2668_v8 = vadd.f32 %v2412_v27, %v2220_v9  ;;  %3897 = vlog2.f32 %v2431_v18  ;;  %vm2420_vm7 = vcmp.lt.f32.partialorder %v2419_v37, 0.0004427343 }
 0x2ef   :  { %v3302_v30 = vadd.f32 %v3301_v29, %v3300_v4  ;;  %v3303_v16 = vpop.f32.mrb[90].mxu1  ;;  %v2333_v54 = vmul.f32 1.442695, %v2291_v13  ;;  %v2292_v33 = vsub.f32 0.0, %v2260_v51  ;;  %3899 = vpow2.f32 %v2331_v38 }
 0x2f0   :  { %v3890_v44 = vpop.eup %3889  ;;  %v3304_v56 = vpop.f32.mrb[91].mxu1  ;;  %v4617_v55 = vsel %vm4559_vm5, %v2699_v34, %v4482_v0  ;;  %v2700_v24 = vadd.f32 0.0001, %v2668_v8  ;;  %v2426_v43 = vadd.f32 1.0, %v2425_v26  ;;  %v2224_v28 = vmax.f32 %v4514_v59, 0.0 }
 0x2f1   :  { %v4611_v39 = vadd.f32 %v3302_v30, %v4471_v62  ;;  %v3305_v31 = vadd.f32 %v3304_v56, %v3303_v16  ;;  %v2415_v21 = vmul.f32 0.6931472, %v3890_v44  ;;  %v4619_v46 = vpop.eup %3891  ;;  %2800 = vrot.lane.b32.xlu1 %v4617_v55, %s4121_s0  ;;  %v2225_v53 = vmax.f32 %v4534_v49, 0.0 }
 0x2f2   :  { %v2434_v0 = vmul.f32 -0.5, %v4580_v50  ;;  %v2226_v47 = vmax.f32 %v4542_v23, 0.0  ;;  %vm4633_vm8 = vcmp.lt.f32.partialorder %v2428_v19, 0.0004427343  ;;  %3901 = vpow2.f32 %v2333_v54 }
 0x2f3   :  { %v4622_v9 = vadd.f32 %v3305_v31, %v4471_v62  ;;  %v2421_v7 = vsel %vm2420_vm7, %v2418_v58, %v2415_v21  ;;  %v2261_v40 = vand.u32 2147483647, %v4611_v39  ;;  %v3894_v41 = vpop.eup %3893  ;;  %v2335_v57 = vmul.f32 1.442695, %v2292_v33 }
 0x2f4   :  { %v2669_v5 = vadd.f32 %v2421_v7, %v2221_v36  ;;  %v4640_v20 = vsel %vm4559_vm5, %v2700_v24, %v4486_v17  ;;  %v2440_v10 = vadd.f32 1.0, %v4619_v46  ;;  %v4643_v60 = vpop.eup %3895  ;;  %v2427_v13 = vmul.f32 %v4547_v52, %v2426_v43 }
 0x2f5   :  { %v3306_v32 = vpop.f32.mrb[92].mxu1  ;;  %v2262_v42 = vand.u32 2147483647, %v4622_v9  ;;  %2802 = vrot.lane.b32.xlu1 %v4640_v20, %s4121_s0  ;;  %v2424_v6 = vmul.f32 0.6931472, %v3894_v41  ;;  %v2435_v37 = vadd.f32 1.0, %v2434_v0 }
 0x2f6   :  { %v3307_v48 = vpop.f32.mrb[93].mxu1  ;;  %v2701_v22 = vadd.f32 0.0001, %v2669_v5  ;;  %v2437_v17 = vand.u32 2147483647, %v4580_v50  ;;  %3903 = vlog2.f32 %v2440_v10  ;;  %v2293_v51 = vsub.f32 0.0, %v2261_v40 }
 0x2f7   :  { %v3308_v36 = vadd.f32 %v3307_v48, %v3306_v32  ;;  %v3309_v2 = vpop.f32.mrb[94].mxu1  ;;  %v2443_v18 = vmul.f32 -0.5, %v4619_v46  ;;  %v2227_v30 = vmax.f32 %v4569_v1, 0.0  ;;  %v2228_v16 = vmax.f32 %v4584_v11, 0.0 }
 0x2f8   :  { %v3310_v4 = vpop.f32.mrb[95].mxu1  ;;  %v3898_v38 = vpop.eup %3897  ;;  %v4659_v52 = vsel %vm4559_vm5, %v2701_v22, %v4490_v15  ;;  %v2430_v34 = vsel %vm4633_vm8, %v2427_v13, %v2424_v6  ;;  %3905 = vpow2.f32 %v2335_v57  ;;  %v2294_v26 = vsub.f32 0.0, %v2262_v42 }
 0x2f9   :  { %v4651_v29 = vadd.f32 %v3308_v36, %v4471_v62  ;;  %v3311_v27 = vadd.f32 %v3310_v4, %v3309_v2  ;;  %2804 = vrot.lane.b32.xlu0 %v4659_v52, %s4121_s0  ;;  %v2670_v8 = vadd.f32 %v2430_v34, %v2222_v25  ;;  %v2433_v58 = vmul.f32 0.6931472, %v3898_v38  ;;  %v4673_v31 = vpop.eup %3899 }
 0x2fa   :  { %v2436_v15 = vmul.f32 %v4580_v50, %v2435_v37  ;;  %v2449_v54 = vadd.f32 1.0, %v4643_v60  ;;  %v2337_v19 = vmul.f32 1.442695, %v2293_v51  ;;  %vm2438_vm9 = vcmp.lt.f32.partialorder %v2437_v17, 0.0004427343 }
 0x2fb   :  { %v2263_v44 = vand.u32 2147483647, %v4651_v29  ;;  %v4665_v56 = vadd.f32 %v3311_v27, %v4471_v62  ;;  %v2444_v24 = vadd.f32 1.0, %v2443_v18  ;;  %v2702_v43 = vadd.f32 0.0001, %v2670_v8 }
 0x2fc   :  { %v2439_v0 = vsel %vm2438_vm9, %v2436_v15, %v2433_v58  ;;  %3907 = vlog2.f32 %v2449_v54  ;;  %v2339_v40 = vmul.f32 1.442695, %v2294_v26  ;;  %v4678_v12 = vpop.eup %3901  ;;  %v2229_v41 = vmax.f32 %v4611_v39, 0.0 }
 0x2fd   :  { %v3312_v33 = vpop.f32.mrb[96].mxu1  ;;  %v2295_v21 = vsub.f32 0.0, %v2263_v44  ;;  %v2264_v32 = vand.u32 2147483647, %v4665_v56  ;;  %v2671_v50 = vadd.f32 %v2439_v0, %v2223_v35  ;;  %v2230_v57 = vmax.f32 %v4622_v9, 0.0 }
 0x2fe   :  { %v3313_v7 = vpop.f32.mrb[97].mxu1  ;;  %v4685_v48 = vsel %vm4559_vm5, %v2702_v43, %v4496_v14  ;;  %v2458_v42 = vadd.f32 1.0, %v4673_v31  ;;  %3909 = vpow2.f32 %v2337_v19  ;;  %v2446_v35 = vand.u32 2147483647, %v4619_v46 }
 0x2ff   :  { %v3314_v25 = vadd.f32 %v3313_v7, %v3312_v33  ;;  %v3315_v5 = vpop.f32.mrb[98].mxu1  ;;  %2806 = vrot.lane.b32.xlu1 %v4685_v48, %s4121_s0  ;;  %v2452_v2 = vmul.f32 -0.5, %v4643_v60  ;;  %v2341_v13 = vmul.f32 1.442695, %v2295_v21  ;;  %v2703_v6 = vadd.f32 0.0001, %v2671_v50 }
 0x300   :  { %v3316_v10 = vpop.f32.mrb[99].mxu1  ;;  %v3904_v22 = vpop.eup %3903  ;;  %3911 = vlog2.f32 %v2458_v42  ;;  %v2231_v14 = vmax.f32 %v4651_v29, 0.0  ;;  %v2296_v37 = vsub.f32 0.0, %v2264_v32  ;;  %v2445_v17 = vmul.f32 %v4619_v46, %v2444_v24 }
 0x301   :  { %v3317_v36 = vadd.f32 %v3316_v10, %v3315_v5  ;;  %v4693_v4 = vadd.f32 %v3314_v25, %v4471_v62  ;;  %3913 = vpow2.f32 %v2339_v40  ;;  %v4703_v27 = vsel %vm4559_vm5, %v2703_v6, %v4507_v45 }
 0x302   :  { %v2442_v18 = vmul.f32 0.6931472, %v3904_v22  ;;  %v2455_v38 = vand.u32 2147483647, %v4643_v60  ;;  %v4706_v34 = vpop.eup %3905  ;;  %2808 = vrot.lane.b32.xlu0 %v4703_v27, %s4121_s0  ;;  %vm2447_vm10 = vcmp.lt.f32.partialorder %v2446_v35, 0.0004427343  ;;  %3915 = vpow2.f32 %v2341_v13 }
 0x303   :  { %v4698_v51 = vadd.f32 %v3317_v36, %v4471_v62  ;;  %v2453_v44 = vadd.f32 1.0, %v2452_v2  ;;  %v2461_v46 = vmul.f32 -0.5, %v4673_v31  ;;  %v2467_v8 = vadd.f32 1.0, %v4678_v12 }
 0x304   :  { %v2232_v58 = vmax.f32 %v4665_v56, 0.0  ;;  %v2265_v45 = vand.u32 2147483647, %v4693_v4  ;;  %v2448_v15 = vsel %vm2447_vm10, %v2445_v17, %v2442_v18  ;;  %v2343_v19 = vmul.f32 1.442695, %v2296_v37 }
 0x305   :  { %v3318_v26 = vpop.f32.mrb[100].mxu1  ;;  %v2672_v33 = vadd.f32 %v2448_v15, %v2224_v28  ;;  %v2464_v43 = vand.u32 2147483647, %v4673_v31  ;;  %v2266_v0 = vand.u32 2147483647, %v4698_v51  ;;  %3917 = vlog2.f32 %v2467_v8 }
 0x306   :  { %v3319_v54 = vpop.f32.mrb[101].mxu1  ;;  %v3908_v7 = vpop.eup %3907  ;;  %vm4718_vm11 = vcmp.lt.f32.partialorder %v2455_v38, 0.0004427343  ;;  %v2476_v25 = vadd.f32 1.0, %v4706_v34  ;;  %v2454_v28 = vmul.f32 %v4643_v60, %v2453_v44  ;;  %v2462_v10 = vadd.f32 1.0, %v2461_v46 }
 0x307   :  { %v3320_v24 = vadd.f32 %v3319_v54, %v3318_v26  ;;  %v3321_v21 = vpop.f32.mrb[102].mxu1  ;;  %v2704_v5 = vadd.f32 0.0001, %v2672_v33  ;;  %v2297_v42 = vsub.f32 0.0, %v2265_v45  ;;  %v2451_v35 = vmul.f32 0.6931472, %v3908_v7 }
 0x308   :  { %v3322_v40 = vpop.f32.mrb[103].mxu1  ;;  %v2470_v2 = vmul.f32 -0.5, %v4678_v12  ;;  %v4728_v22 = vpop.eup %3909  ;;  %3919 = vpow2.f32 %v2343_v19  ;;  %v2233_v13 = vmax.f32 %v4693_v4, 0.0  ;;  %vm4736_vm12 = vcmp.lt.f32.partialorder %v2464_v43, 0.0004427343 }
 0x309   :  { %v4724_v50 = vadd.f32 %v3320_v24, %v4471_v62  ;;  %v3323_v36 = vadd.f32 %v3322_v40, %v3321_v21  ;;  %v4734_v6 = vsel %vm4559_vm5, %v2704_v5, %v4514_v59  ;;  %v2298_v17 = vsub.f32 0.0, %v2266_v0 }
 0x30a   :  { %v3912_v60 = vpop.eup %3911  ;;  %2810 = vrot.lane.b32.xlu1 %v4734_v6, %s4121_s0  ;;  %v2457_v38 = vsel %vm4718_vm11, %v2454_v28, %v2451_v35  ;;  %3921 = vlog2.f32 %v2476_v25  ;;  %v2463_v8 = vmul.f32 %v4673_v31, %v2462_v10  ;;  %v2345_v15 = vmul.f32 1.442695, %v2297_v42 }
 0x30b   :  { %v4743_v18 = vadd.f32 %v3323_v36, %v4471_v62  ;;  %v4747_v26 = vpop.eup %3913  ;;  %v2267_v59 = vand.u32 2147483647, %v4724_v50  ;;  %v2673_v44 = vadd.f32 %v2457_v38, %v2225_v53  ;;  %v2460_v46 = vmul.f32 0.6931472, %v3912_v60 }
 0x30c   :  { %v2471_v19 = vadd.f32 1.0, %v2470_v2  ;;  %v2479_v33 = vmul.f32 -0.5, %v4706_v34  ;;  %v2485_v24 = vadd.f32 1.0, %v4728_v22  ;;  %v4758_v53 = vpop.eup %3915  ;;  %v2234_v31 = vmax.f32 %v4698_v51, 0.0 }
 0x30d   :  { %v3324_v45 = vpop.f32.mrb[104].mxu1  ;;  %v2268_v21 = vand.u32 2147483647, %v4743_v18  ;;  %v2705_v43 = vadd.f32 0.0001, %v2673_v44  ;;  %v2466_v7 = vsel %vm4736_vm12, %v2463_v8, %v2460_v46  ;;  %v2299_v10 = vsub.f32 0.0, %v2267_v59 }
 0x30e   :  { %v3325_v54 = vpop.f32.mrb[105].mxu1  ;;  %v2347_v32 = vmul.f32 1.442695, %v2298_v17  ;;  %v2674_v25 = vadd.f32 %v2466_v7, %v2226_v47  ;;  %v2473_v28 = vand.u32 2147483647, %v4678_v12  ;;  %v2472_v47 = vmul.f32 %v4678_v12, %v2471_v19 }
 0x30f   :  { %v3326_v0 = vadd.f32 %v3325_v54, %v3324_v45  ;;  %v3327_v40 = vpop.f32.mrb[106].mxu1  ;;  %v4767_v42 = vsel %vm4559_vm5, %v2705_v43, %v4534_v49  ;;  %v3918_v2 = vpop.eup %3917  ;;  %v2482_v60 = vand.u32 2147483647, %v4706_v34  ;;  %3923 = vlog2.f32 %v2485_v24 }
 0x310   :  { %v3328_v5 = vpop.f32.mrb[107].mxu1  ;;  %2812 = vrot.lane.b32.xlu0 %v4767_v42, %s4121_s0  ;;  %v2706_v37 = vadd.f32 0.0001, %v2674_v25  ;;  %v2300_v17 = vsub.f32 0.0, %v2268_v21  ;;  %v2469_v49 = vmul.f32 0.6931472, %v3918_v2  ;;  %3925 = vpow2.f32 %v2345_v15 }
 0x311   :  { %v4770_v36 = vadd.f32 %v3326_v0, %v4471_v62  ;;  %v3329_v35 = vadd.f32 %v3328_v5, %v3327_v40  ;;  %v2480_v59 = vadd.f32 1.0, %v2479_v33  ;;  %vm2474_vm13 = vcmp.lt.f32.partialorder %v2473_v28, 0.0004427343 }
 0x312   :  { %v4782_v44 = vsel %vm4559_vm5, %v2706_v37, %v4542_v23  ;;  %v2488_v46 = vmul.f32 -0.5, %v4728_v22  ;;  %v4785_v8 = vpop.eup %3919  ;;  %3927 = vpow2.f32 %v2347_v32  ;;  %v2349_v12 = vmul.f32 1.442695, %v2299_v10 }
 0x313   :  { %v4777_v38 = vadd.f32 %v3329_v35, %v4471_v62  ;;  %2814 = vrot.lane.b32.xlu1 %v4782_v44, %s4121_s0  ;;  %v2269_v45 = vand.u32 2147483647, %v4770_v36  ;;  %v2475_v54 = vsel %vm2474_vm13, %v2472_v47, %v2469_v49  ;;  %vm4793_vm14 = vcmp.lt.f32.partialorder %v2482_v60, 0.0004427343 }
 0x314   :  { %v3922_v15 = vpop.eup %3921  ;;  %v2675_v23 = vadd.f32 %v2475_v54, %v2227_v30  ;;  %v2494_v43 = vadd.f32 1.0, %v4747_v26  ;;  %v2351_v7 = vmul.f32 1.442695, %v2300_v17  ;;  %v2481_v40 = vmul.f32 %v4706_v34, %v2480_v59 }
 0x315   :  { %v3330_v19 = vpop.f32.mrb[108].mxu1  ;;  %v2270_v33 = vand.u32 2147483647, %v4777_v38  ;;  %v2478_v0 = vmul.f32 0.6931472, %v3922_v15  ;;  %v2489_v10 = vadd.f32 1.0, %v2488_v46 }
 0x316   :  { %v3331_v21 = vpop.f32.mrb[109].mxu1  ;;  %v2707_v5 = vadd.f32 0.0001, %v2675_v23  ;;  %v2491_v35 = vand.u32 2147483647, %v4728_v22  ;;  %3929 = vlog2.f32 %v2494_v43  ;;  %v2301_v30 = vsub.f32 0.0, %v2269_v45 }
 0x317   :  { %v3332_v32 = vadd.f32 %v3331_v21, %v3330_v19  ;;  %v3333_v25 = vpop.f32.mrb[110].mxu1  ;;  %3931 = vpow2.f32 %v2349_v12  ;;  %v2484_v2 = vsel %vm4793_vm14, %v2481_v40, %v2478_v0  ;;  %v2302_v47 = vsub.f32 0.0, %v2270_v33 }
 0x318   :  { %v3334_v28 = vpop.f32.mrb[111].mxu1  ;;  %v4808_v34 = vsel %vm4559_vm5, %v2707_v5, %v4569_v1  ;;  %v2676_v60 = vadd.f32 %v2484_v2, %v2228_v16  ;;  %v2235_v49 = vmax.f32 %v4724_v50, 0.0  ;;  %3933 = vpow2.f32 %v2351_v7 }
 0x319   :  { %v4803_v37 = vadd.f32 %v3332_v32, %v4471_v62  ;;  %v3335_v17 = vadd.f32 %v3334_v28, %v3333_v25  ;;  %2816 = vrot.lane.b32.xlu0 %v4808_v34, %s4121_s0  ;;  %v2497_v46 = vmul.f32 -0.5, %v4747_v26  ;;  %v3924_v12 = vpop.eup %3923  ;;  %v2490_v54 = vmul.f32 %v4728_v22, %v2489_v10 }
 0x31a   :  { %v2708_v45 = vadd.f32 0.0001, %v2676_v60  ;;  %vm4818_vm15 = vcmp.lt.f32.partialorder %v2491_v35, 0.0004427343  ;;  %v2503_v16 = vadd.f32 1.0, %v4758_v53  ;;  %v2512_v24 = vadd.f32 1.0, %v4785_v8  ;;  %v4827_v21 = vpop.eup %3925 }
 0x31b   :  { %v2271_v59 = vand.u32 2147483647, %v4803_v37  ;;  %v2353_v19 = vmul.f32 1.442695, %v2301_v30  ;;  %v4824_v15 = vadd.f32 %v3335_v17, %v4471_v62  ;;  %v2487_v33 = vmul.f32 0.6931472, %v3924_v12 }
 0x31c   :  { %v2355_v43 = vmul.f32 1.442695, %v2302_v47  ;;  %v4832_v22 = vsel %vm4559_vm5, %v2708_v45, %v4584_v11  ;;  %v2500_v7 = vand.u32 2147483647, %v4747_v26  ;;  %3935 = vlog2.f32 %v2503_v16  ;;  %v4835_v40 = vpop.eup %3927 }
 0x31d   :  { %v3336_v23 = vpop.f32.mrb[112].mxu1  ;;  %2818 = vrot.lane.b32.xlu1 %v4832_v22, %s4121_s0  ;;  %v2303_v32 = vsub.f32 0.0, %v2271_v59  ;;  %v2493_v25 = vsel %vm4818_vm15, %v2490_v54, %v2487_v33  ;;  %v2498_v5 = vadd.f32 1.0, %v2497_v46  ;;  %v2506_v2 = vmul.f32 -0.5, %v4758_v53 }
 0x31e   :  { %v3337_v0 = vpop.f32.mrb[113].mxu1  ;;  %v2677_v11 = vadd.f32 %v2493_v25, %v2229_v41  ;;  %3937 = vlog2.f32 %v2512_v24  ;;  %v2272_v47 = vand.u32 2147483647, %v4824_v15  ;;  %vm2501_vm0 = vcmp.lt.f32.partialorder %v2500_v7, 0.0004427343 }
 0x31f   :  { %v3338_v28 = vadd.f32 %v3337_v0, %v3336_v23  ;;  %v3339_v10 = vpop.f32.mrb[114].mxu1  ;;  %3939 = vpow2.f32 %v2353_v19  ;;  %v2357_v41 = vmul.f32 1.442695, %v2303_v32  ;;  %v2499_v16 = vmul.f32 %v4747_v26, %v2498_v5 }
 0x320   :  { %v3340_v30 = vpop.f32.mrb[115].mxu1  ;;  %v3930_v59 = vpop.eup %3929  ;;  %3941 = vpow2.f32 %v2355_v43  ;;  %v2709_v45 = vadd.f32 0.0001, %v2677_v11  ;;  %v2507_v23 = vadd.f32 1.0, %v2506_v2  ;;  %v2515_v24 = vmul.f32 -0.5, %v4785_v8 }
 0x321   :  { %v4847_v60 = vadd.f32 %v3338_v28, %v4471_v62  ;;  %v3341_v17 = vadd.f32 %v3340_v30, %v3339_v10  ;;  %v4851_v54 = vpop.eup %3931  ;;  %v2496_v1 = vmul.f32 0.6931472, %v3930_v59  ;;  %v2304_v32 = vsub.f32 0.0, %v2272_v47 }
 0x322   :  { %v4857_v19 = vsel %vm4559_vm5, %v2709_v45, %v4611_v39  ;;  %v4863_v43 = vpop.eup %3933  ;;  %v2509_v28 = vand.u32 2147483647, %v4758_v53  ;;  %v2521_v11 = vadd.f32 1.0, %v4827_v21  ;;  %3943 = vpow2.f32 %v2357_v41 }
 0x323   :  { %v4860_v33 = vadd.f32 %v3341_v17, %v4471_v62  ;;  %2820 = vrot.lane.b32.xlu0 %v4857_v19, %s4121_s0  ;;  %v2502_v26 = vsel %vm2501_vm0, %v2499_v16, %v2496_v1  ;;  %v2273_v7 = vand.u32 2147483647, %v4847_v60  ;;  %v2516_v30 = vadd.f32 1.0, %v2515_v24 }
 0x324   :  { %v2678_v5 = vadd.f32 %v2502_v26, %v2230_v57  ;;  %v2518_v2 = vand.u32 2147483647, %v4785_v8  ;;  %v2508_v16 = vmul.f32 %v4758_v53, %v2507_v23  ;;  %3945 = vlog2.f32 %v2521_v11 }
 0x325   :  { %v3342_v25 = vpop.f32.mrb[116].mxu1  ;;  %v2274_v1 = vand.u32 2147483647, %v4860_v33  ;;  %v2359_v57 = vmul.f32 1.442695, %v2304_v32  ;;  %v2305_v26 = vsub.f32 0.0, %v2273_v7  ;;  %v2517_v32 = vmul.f32 %v4785_v8, %v2516_v30 }
 0x326   :  { %v3343_v10 = vpop.f32.mrb[117].mxu1  ;;  %v3936_v59 = vpop.eup %3935  ;;  %v2710_v45 = vadd.f32 0.0001, %v2678_v5  ;;  %vm2510_vm1 = vcmp.lt.f32.partialorder %v2509_v28, 0.0004427343  ;;  %v2524_v5 = vmul.f32 -0.5, %v4827_v21 }
 0x327   :  { %v3344_v47 = vadd.f32 %v3343_v10, %v3342_v25  ;;  %v3345_v17 = vpop.f32.mrb[118].mxu1  ;;  %v2505_v0 = vmul.f32 0.6931472, %v3936_v59  ;;  %vm2519_vm2 = vcmp.lt.f32.partialorder %v2518_v2, 0.0004427343  ;;  %v2306_v11 = vsub.f32 0.0, %v2274_v1 }
 0x328   :  { %v3346_v39 = vpop.f32.mrb[119].mxu1  ;;  %v3938_v41 = vpop.eup %3937  ;;  %v4883_v24 = vsel %vm4559_vm5, %v2710_v45, %v4622_v9  ;;  %3947 = vpow2.f32 %v2359_v57  ;;  %v2525_v2 = vadd.f32 1.0, %v2524_v5 }
 0x329   :  { %v4878_v12 = vadd.f32 %v3344_v47, %v4471_v62  ;;  %v3347_v25 = vadd.f32 %v3346_v39, %v3345_v17  ;;  %v4886_v10 = vpop.eup %3939  ;;  %2822 = vrot.lane.b32.xlu1 %v4883_v24, %s4121_s0  ;;  %v2511_v53 = vsel %vm2510_vm1, %v2508_v16, %v2505_v0  ;;  %v2514_v23 = vmul.f32 0.6931472, %v3938_v41 }
 0x32a   :  { %v4891_v7 = vpop.eup %3941  ;;  %v2679_v9 = vadd.f32 %v2511_v53, %v2231_v14  ;;  %v2361_v47 = vmul.f32 1.442695, %v2305_v26  ;;  %v2530_v0 = vadd.f32 1.0, %v4835_v40  ;;  %v2527_v41 = vand.u32 2147483647, %v4827_v21 }
 0x32b   :  { %v2275_v39 = vand.u32 2147483647, %v4878_v12  ;;  %v4897_v28 = vadd.f32 %v3347_v25, %v4471_v62  ;;  %v2520_v17 = vsel %vm2519_vm2, %v2517_v32, %v2514_v23  ;;  %v2363_v26 = vmul.f32 1.442695, %v2306_v11 }
 0x32c   :  { %v2711_v45 = vadd.f32 0.0001, %v2679_v9  ;;  %v2680_v8 = vadd.f32 %v2520_v17, %v2232_v58  ;;  %3949 = vlog2.f32 %v2530_v0  ;;  %v4910_v32 = vpop.eup %3943  ;;  %v2533_v9 = vmul.f32 -0.5, %v4835_v40 }
 0x32d   :  { %v3348_v59 = vpop.f32.mrb[120].mxu1  ;;  %v2307_v30 = vsub.f32 0.0, %v2275_v39  ;;  %v2276_v16 = vand.u32 2147483647, %v4897_v28  ;;  %v2539_v17 = vadd.f32 1.0, %v4851_v54 }
 0x32e   :  { %v3349_v1 = vpop.f32.mrb[121].mxu1  ;;  %v4908_v25 = vsel %vm4559_vm5, %v2711_v45, %v4651_v29  ;;  %v2712_v53 = vadd.f32 0.0001, %v2680_v8  ;;  %v3946_v11 = vpop.eup %3945  ;;  %vm2528_vm3 = vcmp.lt.f32.partialorder %v2527_v41, 0.0004427343 }
 0x32f   :  { %v3351_v57 = vpop.f32.mrb[122].mxu1  ;;  %v3350_v23 = vadd.f32 %v3349_v1, %v3348_v59  ;;  %2824 = vrot.lane.b32.xlu0 %v4908_v25, %s4121_s0  ;;  %v2308_v5 = vsub.f32 0.0, %v2276_v16  ;;  %v2365_v0 = vmul.f32 1.442695, %v2307_v30  ;;  %v2526_v59 = vmul.f32 %v4827_v21, %v2525_v2  ;;  %v3995_v1 = vld [vmem:[%s5269_s4] ss:$0 sm:$0xff] }
 0x330   :  { %v3352_v58 = vpop.f32.mrb[123].mxu1  ;;  %v4919_v29 = vsel %vm4559_vm5, %v2712_v53, %v4665_v56  ;;  %v2523_v8 = vmul.f32 0.6931472, %v3946_v11  ;;  %3951 = vlog2.f32 %v2539_v17  ;;  %v2542_v56 = vmul.f32 -0.5, %v4851_v54  ;;  %s4124_s4 = smov [#allocation10]  }
 0x331   :  { %v3353_v39 = vadd.f32 %v3352_v58, %v3351_v57  ;;  %v4923_v45 = vadd.f32 %v3350_v23, %v4471_v62  ;;  %2826 = vrot.lane.b32.xlu1 %v4919_v29, %s4121_s0  ;;  %3953 = vpow2.f32 %v2361_v47  ;;  %v2367_v21 = vmul.f32 1.442695, %v2308_v5  ;;  %s3025_s29 = sshll.u32 %s4124_s4, 4  ;;  %s3026_s29 = int_to_ptr.vmem [resolvable:$true] %s3025_s29 }
 0x332   :  { %v2529_v62 = vsel %vm2528_vm3, %v2526_v59, %v2523_v8  ;;  %v2534_v2 = vadd.f32 1.0, %v2533_v9  ;;  %v2536_v57 = vand.u32 2147483647, %v4835_v40  ;;  %3955 = vpow2.f32 %v2363_v26  ;;  %v4940_v11 = vpop.eup %3947  ;;  %s4084_s30 = scalar_lea.vmem %s3026_s29, 4096  ;;  %p4089_p5 = scmp.lt.s32.totalorder %s3026_s29, %s3026_s29 }
 0x333   :  { %v4930_v16 = vadd.f32 %v3995_v1, %v3353_v39  ;;  %v2277_v53 = vand.u32 2147483647, %v4923_v45  ;;  %v2681_v39 = vadd.f32 %v2529_v62, %v2233_v13  ;;  %3957 = vpow2.f32 %v2365_v0  ;;  %p4085_p4 = scmp.ne.s32.totalorder %s3026_s29, %s4084_s30  ;;  %p4090_p6 = scmp.lt.s32.totalorder %s4084_s30, %s4084_s30 }
 0x334   :  { %v2543_v41 = vadd.f32 1.0, %v2542_v56  ;;  %v2545_v5 = vand.u32 2147483647, %v4851_v54  ;;  %v2548_v9 = vadd.f32 1.0, %v4863_v43  ;;  %3959 = vpow2.f32 %v2367_v21 }
 0x335   :  { %v3354_v23 = vpop.f32.mrb[124].mxu1  ;;  %v2278_v17 = vand.u32 2147483647, %v4930_v16  ;;  %v2713_v8 = vadd.f32 0.0001, %v2681_v39  ;;  %v2557_v58 = vadd.f32 1.0, %v4886_v10  ;;  %v2535_v13 = vmul.f32 %v4835_v40, %v2534_v2  ;;  %p4091_p7 = por %p4090_p6, %p4089_p5 }
 0x336   :  { %v3355_v47 = vpop.f32.mrb[125].mxu1  ;;  %v3950_v14 = vpop.eup %3949  ;;  %vm4946_vm4 = vcmp.lt.f32.partialorder %v2536_v57, 0.0004427343  ;;  %v2309_v0 = vsub.f32 0.0, %v2277_v53  ;;  %3961 = vlog2.f32 %v2548_v9  ;;  %v2544_v40 = vmul.f32 %v4851_v54, %v2543_v41 }
 0x337   :  { %v3357_v59 = vpop.f32.mrb[126].mxu1  ;;  %v3356_v26 = vadd.f32 %v3355_v47, %v3354_v23  ;;  %v4953_v56 = vsel %vm4559_vm5, %v2713_v8, %v4693_v4  ;;  %v2532_v21 = vmul.f32 0.6931472, %v3950_v14  ;;  %v2310_v39 = vsub.f32 0.0, %v2278_v17  ;;  %p4092_p8 = pnand %p4091_p7, %p4085_p4 }
 0x338   :  { %v3358_v30 = vpop.f32.mrb[127].mxu1  ;;  %2828 = vrot.lane.b32.xlu0 %v4953_v56, %s4121_s0  ;;  %v2551_v2 = vmul.f32 -0.5, %v4863_v43  ;;  %v2560_v53 = vmul.f32 -0.5, %v4886_v10  ;;  %vm4964_vm6 = vcmp.lt.f32.partialorder %v2545_v5, 0.0004427343  ;;  %3963 = vlog2.f32 %v2557_v58 }
 0x339   :  { %v4955_v23 = vadd.f32 %v3995_v1, %v3356_v26  ;;  %v3359_v57 = vadd.f32 %v3358_v30, %v3357_v59  ;;  %v2538_v47 = vsel %vm4946_vm4, %v2535_v13, %v2532_v21  ;;  %v2369_v54 = vmul.f32 1.442695, %v2309_v0 }
 0x33a   :  { %v3952_v17 = vpop.eup %3951  ;;  %v2682_v9 = vadd.f32 %v2538_v47, %v2234_v31  ;;  %v2554_v41 = vand.u32 2147483647, %v4863_v43  ;;  %v2371_v8 = vmul.f32 1.442695, %v2310_v39  ;;  %v2566_v13 = vadd.f32 1.0, %v4891_v7 }
 0x33b   :  { %v2279_v14 = vand.u32 2147483647, %v4955_v23  ;;  %v4972_v30 = vadd.f32 %v3995_v1, %v3359_v57  ;;  %v4974_v59 = vpop.eup %3953  ;;  %v2541_v26 = vmul.f32 0.6931472, %v3952_v17  ;;  %v2552_v21 = vadd.f32 1.0, %v2551_v2 }
 0x33c   :  { %v2714_v62 = vadd.f32 0.0001, %v2682_v9  ;;  %v2561_v46 = vadd.f32 1.0, %v2560_v53  ;;  %v4978_v35 = vpop.eup %3955  ;;  %v2244_v31 = vmax.f32 %v4897_v28, 0.0  ;;  %3965 = vlog2.f32 %v2566_v13 }
 0x33d   :  { %v2311_v5 = vsub.f32 0.0, %v2279_v14  ;;  %v2280_v58 = vand.u32 2147483647, %v4972_v30  ;;  %v2547_v1 = vsel %vm4964_vm6, %v2544_v40, %v2541_v26  ;;  %v2569_v0 = vmul.f32 -0.5, %v4891_v7  ;;  %v4984_v39 = vpop.eup %3957 }
 0x33e   :  { %v4989_v57 = vsel %vm4559_vm5, %v2714_v62, %v4698_v51  ;;  %v2683_v2 = vadd.f32 %v2547_v1, %v2235_v49  ;;  %v2563_v47 = vand.u32 2147483647, %v4886_v10  ;;  %v4994_v14 = vpop.eup %3959  ;;  %3967 = vpow2.f32 %v2369_v54 }
 0x33f   :  { %v2373_v53 = vmul.f32 1.442695, %v2311_v5  ;;  %2830 = vrot.lane.b32.xlu1 %v4989_v57, %s4121_s0  ;;  %vm4998_vm7 = vcmp.lt.f32.partialorder %v2554_v41, 0.0004427343  ;;  %v2312_v4 = vsub.f32 0.0, %v2280_v58  ;;  %v2575_v51 = vadd.f32 1.0, %v4910_v32 }
 0x340   :  { %v3962_v17 = vpop.eup %3961  ;;  %3969 = vpow2.f32 %v2371_v8  ;;  %v2715_v9 = vadd.f32 0.0001, %v2683_v2  ;;  %v2553_v49 = vmul.f32 %v4863_v43, %v2552_v21  ;;  %v2562_v26 = vmul.f32 %v4886_v10, %v2561_v46 }
 0x341   :  { %v2550_v5 = vmul.f32 0.6931472, %v3962_v17  ;;  %v2570_v13 = vadd.f32 1.0, %v2569_v0  ;;  %v2572_v62 = vand.u32 2147483647, %v4891_v7  ;;  %3971 = vlog2.f32 %v2575_v51 }
 0x342   :  { %v5009_v54 = vsel %vm4559_vm5, %v2715_v9, %v4724_v50  ;;  %3973 = vpow2.f32 %v2373_v53  ;;  %vm5011_vm8 = vcmp.lt.f32.partialorder %v2563_v47, 0.0004427343  ;;  %v2584_v8 = vadd.f32 1.0, %v4940_v11  ;;  %v3964_v43 = vpop.eup %3963 }
 0x343   :  { %2832 = vrot.lane.b32.xlu0 %v5009_v54, %s4121_s0  ;;  %v2556_v46 = vsel %vm4998_vm7, %v2553_v49, %v2550_v5  ;;  %v2375_v10 = vmul.f32 1.442695, %v2312_v4  ;;  %v2578_v21 = vmul.f32 -0.5, %v4910_v32  ;;  %v2587_v50 = vmul.f32 -0.5, %v4940_v11 }
 0x344   :  { %v5298_v58 = vmax.f32 %v4743_v18, 0.0  ;;  %v2559_v0 = vmul.f32 0.6931472, %v3964_v43  ;;  %3975 = vlog2.f32 %v2584_v8  ;;  %v2593_v2 = vadd.f32 1.0, %v4974_v59 }
 0x345   :  { %v2571_v53 = vmul.f32 %v4891_v7, %v2570_v13  ;;  %vm5026_vm9 = vcmp.lt.f32.partialorder %v2572_v62, 0.0004427343  ;;  %v2581_v40 = vand.u32 2147483647, %v4910_v32  ;;  %v2596_v4 = vmul.f32 -0.5, %v4974_v59 }
 0x346   :  { %v2684_v1 = vadd.f32 %v2556_v46, %v5298_v58  ;;  %v2565_v17 = vsel %vm5011_vm8, %v2562_v26, %v2559_v0  ;;  %3977 = vlog2.f32 %v2593_v2  ;;  %v2602_v9 = vadd.f32 1.0, %v4978_v35  ;;  %v3966_v49 = vpop.eup %3965 }
 0x347   :  { %3979 = vpow2.f32 %v2375_v10  ;;  %v5301_v5 = vmax.f32 %v4770_v36, 0.0  ;;  %v2579_v13 = vadd.f32 1.0, %v2578_v21  ;;  %v2590_v62 = vand.u32 2147483647, %v4940_v11 }
 0x348   :  { %v2716_v51 = vadd.f32 0.0001, %v2684_v1  ;;  %v2568_v43 = vmul.f32 0.6931472, %v3966_v49  ;;  %v2588_v46 = vadd.f32 1.0, %v2587_v50  ;;  %3981 = vlog2.f32 %v2602_v9  ;;  %v5043_v26 = vpop.eup %3967 }
 0x349   :  { %v2685_v7 = vadd.f32 %v2565_v17, %v5301_v5  ;;  %v2597_v10 = vadd.f32 1.0, %v2596_v4  ;;  %v2599_v58 = vand.u32 2147483647, %v4974_v59  ;;  %v2611_v21 = vadd.f32 1.0, %v4984_v39 }
 0x34a   :  { %v5041_v8 = vsel %vm4559_vm5, %v2716_v51, %v4743_v18  ;;  %v5049_v1 = vpop.eup %3969  ;;  %v2574_v18 = vsel %vm5026_vm9, %v2571_v53, %v2568_v43  ;;  %vm5053_vm10 = vcmp.lt.f32.partialorder %v2581_v40, 0.0004427343  ;;  %v2605_v50 = vmul.f32 -0.5, %v4978_v35 }
 0x34b   :  { %2834 = vrot.lane.b32.xlu1 %v5041_v8, %s4121_s0  ;;  %v2717_v41 = vadd.f32 0.0001, %v2685_v7  ;;  %v2614_v2 = vmul.f32 -0.5, %v4984_v39  ;;  %v3972_v51 = vpop.eup %3971  ;;  %v5304_v17 = vmax.f32 %v4777_v38, 0.0  ;;  %v2580_v47 = vmul.f32 %v4910_v32, %v2579_v13 }
 0x34c   :  { %3983 = vlog2.f32 %v2611_v21  ;;  %v5067_v53 = vpop.eup %3973  ;;  %v2577_v40 = vmul.f32 0.6931472, %v3972_v51  ;;  %v2589_v49 = vmul.f32 %v4940_v11, %v2588_v46  ;;  %vm5072_vm11 = vcmp.lt.f32.partialorder %v2590_v62, 0.0004427343 }
 0x34d   :  { %v5062_v4 = vsel %vm4559_vm5, %v2717_v41, %v4770_v36  ;;  %v2686_v9 = vadd.f32 %v2574_v18, %v5304_v17  ;;  %v2608_v36 = vand.u32 2147483647, %v4978_v35  ;;  %v2598_v43 = vmul.f32 %v4974_v59, %v2597_v10 }
 0x34e   :  { %2836 = vrot.lane.b32.xlu0 %v5062_v4, %s4121_s0  ;;  %vm5078_vm12 = vcmp.lt.f32.partialorder %v2599_v58, 0.0004427343  ;;  %v2620_v13 = vadd.f32 1.0, %v4994_v14  ;;  %v3976_v41 = vpop.eup %3975  ;;  %v2583_v21 = vsel %vm5053_vm10, %v2580_v47, %v2577_v40  ;;  %v2606_v11 = vadd.f32 1.0, %v2605_v50 }
 0x34f   :  { %v2718_v7 = vadd.f32 0.0001, %v2686_v9  ;;  %v2615_v62 = vadd.f32 1.0, %v2614_v2  ;;  %v2629_v46 = vadd.f32 1.0, %v5043_v26  ;;  %v5309_v59 = vmax.f32 %v4803_v37, 0.0 }
 0x350   :  { %v2586_v58 = vmul.f32 0.6931472, %v3976_v41  ;;  %3985 = vlog2.f32 %v2620_v13  ;;  %v3978_v51 = vpop.eup %3977  ;;  %vm5095_vm13 = vcmp.lt.f32.partialorder %v2608_v36, 0.0004427343  ;;  %v2617_v50 = vand.u32 2147483647, %v4984_v39 }
 0x351   :  { %v5089_v18 = vsel %vm4559_vm5, %v2718_v7, %v4777_v38  ;;  %v2687_v10 = vadd.f32 %v2583_v21, %v5309_v59  ;;  %v2623_v2 = vmul.f32 -0.5, %v4994_v14  ;;  %3987 = vlog2.f32 %v2629_v46  ;;  %v5101_v38 = vpop.eup %3979 }
 0x352   :  { %2838 = vrot.lane.b32.xlu1 %v5089_v18, %s4121_s0  ;;  %v2592_v9 = vsel %vm5072_vm11, %v2589_v49, %v2586_v58  ;;  %v2595_v47 = vmul.f32 0.6931472, %v3978_v51  ;;  %v2632_v40 = vmul.f32 -0.5, %v5043_v26  ;;  %v3982_v7 = vpop.eup %3981  ;;  %v5312_v36 = vmax.f32 %v4824_v15, 0.0 }
 0x353   :  { %v2719_v17 = vadd.f32 0.0001, %v2687_v10  ;;  %v2607_v41 = vmul.f32 %v4978_v35, %v2606_v11  ;;  %v2626_v21 = vand.u32 2147483647, %v4994_v14  ;;  %v2638_v59 = vadd.f32 1.0, %v5049_v1 }
 0x354   :  { %v2688_v13 = vadd.f32 %v2592_v9, %v5312_v36  ;;  %v2601_v49 = vsel %vm5078_vm12, %v2598_v43, %v2595_v47  ;;  %v2604_v5 = vmul.f32 0.6931472, %v3982_v7  ;;  %v2616_v10 = vmul.f32 %v4984_v39, %v2615_v62 }
 0x355   :  { %v5114_v46 = vsel %vm4559_vm5, %v2719_v17, %v4803_v37  ;;  %v5313_v35 = vmax.f32 %v4847_v60, 0.0  ;;  %v2624_v51 = vadd.f32 1.0, %v2623_v2  ;;  %3989 = vlog2.f32 %v2638_v59 }
 0x356   :  { %2840 = vrot.lane.b32.xlu0 %v5114_v46, %s4121_s0  ;;  %v2720_v58 = vadd.f32 0.0001, %v2688_v13  ;;  %v3984_v9 = vpop.eup %3983  ;;  %v2610_v37 = vsel %vm5095_vm13, %v2607_v41, %v2604_v5  ;;  %v2633_v17 = vadd.f32 1.0, %v2632_v40  ;;  %v2641_v32 = vmul.f32 -0.5, %v5049_v1  ;;  %v2892_v41 = vld [vmem:[#allocation8] sm:$0xff] }
 0x357   :  { %v2689_v11 = vadd.f32 %v2601_v49, %v5313_v35  ;;  %v2647_v43 = vadd.f32 1.0, %v5067_v53  ;;  %v5314_v47 = vmax.f32 %v4860_v33, 0.0  ;;  %v2613_v2 = vmul.f32 0.6931472, %v3984_v9 }
 0x358   :  { %v5130_v39 = vsel %vm4559_vm5, %v2720_v58, %v4824_v15  ;;  %v2245_v36 = vmax.f32 %v4923_v45, 0.0  ;;  %vm2618_vm14 = vcmp.lt.f32.partialorder %v2617_v50, 0.0004427343  ;;  %v2635_v0 = vand.u32 2147483647, %v5043_v26 }
 0x359   :  { %v2721_v62 = vadd.f32 0.0001, %v2689_v11  ;;  %v2690_v7 = vadd.f32 %v2610_v37, %v5314_v47  ;;  %2842 = vrot.lane.b32.xlu1 %v5130_v39, %s4121_s0  ;;  %3991 = vlog2.f32 %v2647_v43  ;;  %v2619_v13 = vsel %vm2618_vm14, %v2616_v10, %v2613_v2 }
 0x35a   :  { %v2650_v59 = vmul.f32 -0.5, %v5067_v53  ;;  %v3986_v49 = vpop.eup %3985  ;;  %v5315_v5 = vmax.f32 %v4878_v12, 0.0  ;;  %v2625_v58 = vmul.f32 %v4994_v14, %v2624_v51  ;;  %vm5149_vm15 = vcmp.lt.f32.partialorder %v2626_v21, 0.0004427343 }
 0x35b   :  { %v5141_v40 = vsel %vm4559_vm5, %v2721_v62, %v4847_v60  ;;  %v2722_v15 = vadd.f32 0.0001, %v2690_v7  ;;  %v2656_v60 = vadd.f32 1.0, %v5101_v38  ;;  %v3988_v11 = vpop.eup %3987  ;;  %v2622_v9 = vmul.f32 0.6931472, %v3986_v49  ;;  %v2797_v62 = vpop.permute.xlu0 %2796 }
 0x35c   :  { %2844 = vrot.lane.b32.xlu0 %v5141_v40, %s4121_s0  ;;  %v2691_v50 = vadd.f32 %v2619_v13, %v5315_v5  ;;  %v2634_v37 = vmul.f32 %v5043_v26, %v2633_v17  ;;  %v2642_v43 = vadd.f32 1.0, %v2641_v32  ;;  %v2631_v21 = vmul.f32 0.6931472, %v3988_v11 }
 0x35d   :  { %v5157_v10 = vsel %vm4559_vm5, %v2722_v15, %v4860_v33  ;;  %v2924_v51 = vmul.f32 %v2892_v41, %v2797_v62  ;;  %3993 = vlog2.f32 %v2656_v60  ;;  %v2628_v47 = vsel %vm5149_vm15, %v2625_v58, %v2622_v9  ;;  %v2893_v33 = vld [vmem:[#allocation8 + $0x8] sm:$0xff] }
 0x35e   :  { %2846 = vrot.lane.b32.xlu1 %v5157_v10, %s4121_s0  ;;  %v2723_v14 = vadd.f32 0.0001, %v2691_v50  ;;  %vm2636_vm0 = vcmp.lt.f32.partialorder %v2635_v0, 0.0004427343  ;;  %v2644_v7 = vand.u32 2147483647, %v5049_v1  ;;  %v2692_v17 = vadd.f32 %v2628_v47, %v2244_v31 }
 0x35f   :  { %v2651_v2 = vadd.f32 1.0, %v2650_v59  ;;  %v2637_v32 = vsel %vm2636_vm0, %v2634_v37, %v2631_v21  ;;  %v2956_v15 = vadd.f32 %v2924_v51, %v4574_v63  ;;  %v3990_v13 = vpop.eup %3989  ;;  %v2799_v41 = vpop.permute.xlu0 %2798  ;;  %v2653_v49 = vand.u32 2147483647, %v5067_v53  ;;  %v2894_v63 = vld [vmem:[#allocation8 + $0x10] sm:$0xff] }
 0x360   :  { %v5168_v26 = vsel %vm4559_vm5, %v2723_v14, %v4878_v12  ;;  %v2693_v0 = vadd.f32 %v2637_v32, %v2245_v36  ;;  %v2659_v59 = vmul.f32 -0.5, %v5101_v38  ;;  %v2724_v5 = vadd.f32 0.0001, %v2692_v17 }
 0x361   :  { %2848 = vrot.lane.b32.xlu0 %v5168_v26, %s4121_s0  ;;  %v2640_v50 = vmul.f32 0.6931472, %v3990_v13  ;;  %v2643_v12 = vmul.f32 %v5049_v1, %v2642_v43  ;;  %2988 = vst [vmem:[#allocation10] sm:$0xff] %v2956_v15  ;;  %v2925_v58 = vmul.f32 %v2893_v33, %v2799_v41  ;;  %v2246_v31 = vmax.f32 %v4930_v16, 0.0 }
 0x362   :  { %v2725_v35 = vadd.f32 0.0001, %v2693_v0  ;;  %vm2645_vm1 = vcmp.lt.f32.partialorder %v2644_v7, 0.0004427343  ;;  %v5182_v36 = vsel %vm4559_vm5, %v2724_v5, %v4897_v28  ;;  %v2652_v37 = vmul.f32 %v5067_v53, %v2651_v2  ;;  %v2895_v7 = vld [vmem:[#allocation8 + $0x18] sm:$0xff] }
 0x363   :  { %v3992_v60 = vpop.eup %3991  ;;  %v2646_v11 = vsel %vm2645_vm1, %v2643_v12, %v2640_v50  ;;  %v2957_v9 = vadd.f32 %v2925_v58, %v4598_v61  ;;  %2850 = vrot.lane.b32.xlu1 %v5182_v36, %s4121_s0  ;;  %v2660_v14 = vadd.f32 1.0, %v2659_v59  ;;  %v2801_v21 = vpop.permute.xlu1 %2800  ;;  %v2247_v28 = vmax.f32 %v4955_v23, 0.0 }
 0x364   :  { %v5191_v1 = vsel %vm4559_vm5, %v2725_v35, %v4923_v45  ;;  %v2694_v43 = vadd.f32 %v2646_v11, %v2246_v31  ;;  %v2649_v62 = vmul.f32 0.6931472, %v3992_v60  ;;  %vm2654_vm2 = vcmp.lt.f32.partialorder %v2653_v49, 0.0004427343  ;;  %v2898_v60 = vld [vmem:[#allocation8 + $0x30] sm:$0xff] }
 0x365   :  { %2852 = vrot.lane.b32.xlu0 %v5191_v1, %s4121_s0  ;;  %2989 = vst [vmem:[#allocation10 + $0x8] sm:$0xff] %v2957_v9  ;;  %v2662_v61 = vand.u32 2147483647, %v5101_v38  ;;  %v2926_v53 = vmul.f32 %v2894_v63, %v2801_v21  ;;  %v2661_v15 = vmul.f32 %v5101_v38, %v2660_v14  ;;  %v2248_v0 = vmax.f32 %v4972_v30, 0.0  ;;  %v2900_v14 = vld [vmem:[#allocation8 + $0x40] sm:$0xff] }
 0x366   :  { %v2726_v51 = vadd.f32 0.0001, %v2694_v43  ;;  %v2655_v47 = vsel %vm2654_vm2, %v2652_v37, %v2649_v62 }
 0x367   :  { %v3994_v33 = vpop.eup %3993  ;;  %v2695_v45 = vadd.f32 %v2655_v47, %v2247_v28  ;;  %v2958_v2 = vadd.f32 %v2926_v53, %v4617_v55  ;;  %v2803_v13 = vpop.permute.xlu1 %2802  ;;  %vm2663_vm3 = vcmp.lt.f32.partialorder %v2662_v61, 0.0004427343  ;;  %v2896_v55 = vld [vmem:[#allocation8 + $0x20] sm:$0xff]  ;;  %v2901_v61 = vld [vmem:[#allocation8 + $0x48] sm:$0xff] }
 0x368   :  { %v5201_v17 = vsel %vm4559_vm5, %v2726_v51, %v4930_v16  ;;  %v2658_v32 = vmul.f32 0.6931472, %v3994_v33  ;;  %v2927_v49 = vmul.f32 %v2895_v7, %v2803_v13  ;;  %v2902_v7 = vld [vmem:[#allocation8 + $0x50] sm:$0xff]  ;;  %v2904_v13 = vld [vmem:[#allocation8 + $0x60] sm:$0xff] }
 0x369   :  { %2854 = vrot.lane.b32.xlu1 %v5201_v17, %s4121_s0  ;;  %v2727_v41 = vadd.f32 0.0001, %v2695_v45  ;;  %2990 = vst [vmem:[#allocation10 + $0x10] sm:$0xff] %v2958_v2  ;;  %v2903_v45 = vld [vmem:[#allocation8 + $0x58] sm:$0xff] }
 0x36a   :  { %v2664_v59 = vsel %vm2663_vm3, %v2661_v15, %v2658_v32  ;;  %v2959_v38 = vadd.f32 %v2927_v49, %v4640_v20  ;;  %v2905_v49 = vld [vmem:[#allocation8 + $0x68] sm:$0xff] }
 0x36b   :  { %v5210_v16 = vsel %vm4559_vm5, %v2727_v41, %v4955_v23  ;;  %v2696_v5 = vadd.f32 %v2664_v59, %v2248_v0  ;;  %v2805_v50 = vpop.permute.xlu0 %2804  ;;  %v2897_v23 = vld [vmem:[#allocation8 + $0x28] sm:$0xff] }
 0x36c   :  { %2856 = vrot.lane.b32.xlu0 %v5210_v16, %s4121_s0  ;;  %2991 = vst [vmem:[#allocation10 + $0x18] sm:$0xff] %v2959_v38  ;;  %v2928_v58 = vmul.f32 %v2896_v55, %v2805_v50  ;;  %v2907_v38 = vld [vmem:[#allocation8 + $0x78] sm:$0xff] }
 0x36d   :  { %v2728_v12 = vadd.f32 0.0001, %v2696_v5  ;;  %v2906_v5 = vld [vmem:[#allocation8 + $0x70] sm:$0xff] }
 0x36e   :  { %v2960_v35 = vadd.f32 %v2928_v58, %v4659_v52 }
 0x36f   :  { %v5218_v31 = vsel %vm4559_vm5, %v2728_v12, %v4972_v30 }
 0x370   :  { %2858 = vrot.lane.b32.xlu1 %v5218_v31, %s4121_s0  ;;  %2992 = vst [vmem:[#allocation10 + $0x20] sm:$0xff] %v2960_v35 }
 0x371   :  { %v2807_v20 = vpop.permute.xlu1 %2806 }
 0x372   :  { %v2929_v63 = vmul.f32 %v2897_v23, %v2807_v20 }
 0x374   :  { %v2961_v11 = vadd.f32 %v2929_v63, %v4685_v48  ;;  %v2809_v9 = vpop.permute.xlu0 %2808 }
 0x375   :  { %v2930_v37 = vmul.f32 %v2898_v60, %v2809_v9  ;;  %v2910_v9 = vld [vmem:[#allocation8 + $0x90] sm:$0xff] }
 0x376   :  { %2993 = vst [vmem:[#allocation10 + $0x28] sm:$0xff] %v2961_v11 }
 0x377   :  { %v2962_v43 = vadd.f32 %v2930_v37, %v4703_v27 }
 0x379   :  { %2994 = vst [vmem:[#allocation10 + $0x30] sm:$0xff] %v2962_v43 }
 0x37c   :  { %v2811_v30 = vpop.permute.xlu1 %2810 }
 0x37d   :  { %v2931_v62 = vmul.f32 %v2899_v3, %v2811_v30  ;;  %v2911_v30 = vld [vmem:[#allocation8 + $0x98] sm:$0xff] }
 0x37f   :  { %v2963_v52 = vadd.f32 %v2931_v62, %v4734_v6 }
 0x381   :  { %2995 = vst [vmem:[#allocation10 + $0x38] sm:$0xff] %v2963_v52  ;;  %v2912_v52 = vld [vmem:[#allocation8 + $0xa0] sm:$0xff] }
 0x382   :  { %v2813_v21 = vpop.permute.xlu0 %2812 }
 0x383   :  { %v2932_v28 = vmul.f32 %v2900_v14, %v2813_v21 }
 0x385   :  { %v2964_v53 = vadd.f32 %v2932_v28, %v4767_v42  ;;  %v2815_v51 = vpop.permute.xlu1 %2814  ;;  %v2913_v28 = vld [vmem:[#allocation8 + $0xa8] sm:$0xff] }
 0x386   :  { %v2933_v48 = vmul.f32 %v2901_v61, %v2815_v51  ;;  %v2914_v51 = vld [vmem:[#allocation8 + $0xb0] sm:$0xff] }
 0x387   :  { %2996 = vst [vmem:[#allocation10 + $0x40] sm:$0xff] %v2964_v53 }
 0x388   :  { %v2965_v47 = vadd.f32 %v2933_v48, %v4782_v44 }
 0x38a   :  { %2997 = vst [vmem:[#allocation10 + $0x48] sm:$0xff] %v2965_v47 }
 0x38b   :  { %v2817_v27 = vpop.permute.xlu0 %2816 }
 0x38c   :  { %v2934_v33 = vmul.f32 %v2902_v7, %v2817_v27  ;;  %v2915_v7 = vld [vmem:[#allocation8 + $0xb8] sm:$0xff] }
 0x38e   :  { %v2966_v2 = vadd.f32 %v2934_v33, %v4808_v34 }
 0x38f   :  { %v2819_v6 = vpop.permute.xlu1 %2818 }
 0x390   :  { %2998 = vst [vmem:[#allocation10 + $0x50] sm:$0xff] %v2966_v2  ;;  %v2935_v32 = vmul.f32 %v2903_v45, %v2819_v6  ;;  %v2917_v6 = vld [vmem:[#allocation8 + $0xc8] sm:$0xff] }
 0x392   :  { %v2967_v15 = vadd.f32 %v2935_v32, %v4832_v22 }
 0x394   :  { %2999 = vst [vmem:[#allocation10 + $0x58] sm:$0xff] %v2967_v15 }
 0x395   :  { %v2821_v42 = vpop.permute.xlu0 %2820 }
 0x396   :  { %v2936_v0 = vmul.f32 %v2904_v13, %v2821_v42  ;;  %v2918_v42 = vld [vmem:[#allocation8 + $0xd0] sm:$0xff] }
 0x398   :  { %v2968_v41 = vadd.f32 %v2936_v0, %v4857_v19  ;;  %v2908_v19 = vld [vmem:[#allocation8 + $0x80] sm:$0xff] }
 0x39a   :  { %3000 = vst [vmem:[#allocation10 + $0x60] sm:$0xff] %v2968_v41 }
 0x39b   :  { %v2823_v44 = vpop.permute.xlu1 %2822 }
 0x39c   :  { %v2937_v59 = vmul.f32 %v2905_v49, %v2823_v44  ;;  %v2919_v49 = vld [vmem:[#allocation8 + $0xd8] sm:$0xff] }
 0x39e   :  { %v2969_v55 = vadd.f32 %v2937_v59, %v4883_v24  ;;  %v2909_v24 = vld [vmem:[#allocation8 + $0x88] sm:$0xff]  ;;  %v2920_v59 = vld [vmem:[#allocation8 + $0xe0] sm:$0xff] }
 0x3a0   :  { %3001 = vst [vmem:[#allocation10 + $0x68] sm:$0xff] %v2969_v55 }
 0x3a1   :  { %v2825_v34 = vpop.permute.xlu0 %2824 }
 0x3a2   :  { %v2938_v50 = vmul.f32 %v2906_v5, %v2825_v34 }
 0x3a3   :  { %v2827_v12 = vpop.permute.xlu1 %2826 }
 0x3a4   :  { %v2970_v22 = vadd.f32 %v2938_v50, %v4908_v25  ;;  %v2939_v58 = vmul.f32 %v2907_v38, %v2827_v12 }
 0x3a6   :  { %3002 = vst [vmem:[#allocation10 + $0x70] sm:$0xff] %v2970_v22  ;;  %v2971_v35 = vadd.f32 %v2939_v58, %v4919_v29  ;;  %v2922_v22 = vld [vmem:[#allocation8 + $0xf0] sm:$0xff] }
 0x3a8   :  { %3003 = vst [vmem:[#allocation10 + $0x78] sm:$0xff] %v2971_v35 }
 0x3aa   :  { %v2829_v23 = vpop.permute.xlu0 %2828 }
 0x3ab   :  { %v2940_v20 = vmul.f32 %v2908_v19, %v2829_v23  ;;  %v2923_v19 = vld [vmem:[#allocation8 + $0xf8] sm:$0xff] }
 0x3ad   :  { %v2972_v63 = vadd.f32 %v2940_v20, %v4953_v56 }
 0x3af   :  { %3004 = vst [vmem:[#allocation10 + $0x80] sm:$0xff] %v2972_v63 }
 0x3b1   :  { %v2831_v60 = vpop.permute.xlu1 %2830 }
 0x3b2   :  { %v2941_v11 = vmul.f32 %v2909_v24, %v2831_v60 }
 0x3b4   :  { %v2973_v37 = vadd.f32 %v2941_v11, %v4989_v57 }
 0x3b5   :  { %v2833_v43 = vpop.permute.xlu0 %2832 }
 0x3b6   :  { %3005 = vst [vmem:[#allocation10 + $0x88] sm:$0xff] %v2973_v37  ;;  %v2942_v25 = vmul.f32 %v2910_v9, %v2833_v43 }
 0x3b8   :  { %v2974_v3 = vadd.f32 %v2942_v25, %v5009_v54 }
 0x3ba   :  { %3006 = vst [vmem:[#allocation10 + $0x90] sm:$0xff] %v2974_v3 }
 0x3bd   :  { %v2835_v29 = vpop.permute.xlu1 %2834 }
 0x3be   :  { %v2943_v62 = vmul.f32 %v2911_v30, %v2835_v29 }
 0x3c0   :  { %v2975_v14 = vadd.f32 %v2943_v62, %v5041_v8  ;;  %v2837_v56 = vpop.permute.xlu0 %2836  ;;  %v2916_v8 = vld [vmem:[#allocation8 + $0xc0] sm:$0xff] }
 0x3c1   :  { %v2944_v21 = vmul.f32 %v2912_v52, %v2837_v56 }
 0x3c2   :  { %3007 = vst [vmem:[#allocation10 + $0x98] sm:$0xff] %v2975_v14 }
 0x3c3   :  { %v2976_v61 = vadd.f32 %v2944_v21, %v5062_v4 }
 0x3c4   :  { %v2839_v53 = vpop.permute.xlu1 %2838 }
 0x3c5   :  { %3008 = vst [vmem:[#allocation10 + $0xa0] sm:$0xff] %v2976_v61  ;;  %v2945_v57 = vmul.f32 %v2913_v28, %v2839_v53 }
 0x3c7   :  { %v2977_v48 = vadd.f32 %v2945_v57, %v5089_v18 }
 0x3c8   :  { %v2841_v54 = vpop.permute.xlu0 %2840 }
 0x3c9   :  { %3009 = vst [vmem:[#allocation10 + $0xa8] sm:$0xff] %v2977_v48  ;;  %v2946_v47 = vmul.f32 %v2914_v51, %v2841_v54 }
 0x3cb   :  { %v2978_v27 = vadd.f32 %v2946_v47, %v5114_v46  ;;  %v2843_v33 = vpop.permute.xlu1 %2842 }
 0x3cc   :  { %v2947_v45 = vmul.f32 %v2915_v7, %v2843_v33 }
 0x3cd   :  { %3010 = vst [vmem:[#allocation10 + $0xb0] sm:$0xff] %v2978_v27 }
 0x3ce   :  { %v2845_v2 = vpop.permute.xlu0 %2844  ;;  %v2979_v4 = vadd.f32 %v2947_v45, %v5130_v39 }
 0x3cf   :  { %v2948_v32 = vmul.f32 %v2916_v8, %v2845_v2 }
 0x3d0   :  { %v2847_v15 = vpop.permute.xlu1 %2846  ;;  %3011 = vst [vmem:[#allocation10 + $0xb8] sm:$0xff] %v2979_v4 }
 0x3d1   :  { %v2980_v13 = vadd.f32 %v2948_v32, %v5141_v40  ;;  %v2949_v18 = vmul.f32 %v2917_v6, %v2847_v15  ;;  %v2921_v40 = vld [vmem:[#allocation8 + $0xe8] sm:$0xff] }
 0x3d3   :  { %3012 = vst [vmem:[#allocation10 + $0xc0] sm:$0xff] %v2980_v13  ;;  %v2981_v0 = vadd.f32 %v2949_v18, %v5157_v10  ;;  %v2849_v41 = vpop.permute.xlu0 %2848 }
 0x3d4   :  { %v2950_v46 = vmul.f32 %v2918_v42, %v2849_v41 }
 0x3d5   :  { %3013 = vst [vmem:[#allocation10 + $0xc8] sm:$0xff] %v2981_v0  ;;  %v2851_v55 = vpop.permute.xlu1 %2850 }
 0x3d6   :  { %v2982_v44 = vadd.f32 %v2950_v46, %v5168_v26  ;;  %v2951_v39 = vmul.f32 %v2919_v49, %v2851_v55 }
 0x3d7   :  { %v2853_v5 = vpop.permute.xlu0 %2852 }
 0x3d8   :  { %3014 = vst [vmem:[#allocation10 + $0xd0] sm:$0xff] %v2982_v44  ;;  %v2952_v34 = vmul.f32 %v2920_v59, %v2853_v5  ;;  %v2983_v38 = vadd.f32 %v2951_v39, %v5182_v36 }
 0x3da   :  { %v2984_v50 = vadd.f32 %v2952_v34, %v5191_v1  ;;  %3015 = vst [vmem:[#allocation10 + $0xd8] sm:$0xff] %v2983_v38 }
 0x3db   :  { %v2855_v12 = vpop.permute.xlu1 %2854 }
 0x3dc   :  { %3016 = vst [vmem:[#allocation10 + $0xe0] sm:$0xff] %v2984_v50  ;;  %v2953_v10 = vmul.f32 %v2921_v40, %v2855_v12 }
 0x3de   :  { %v2985_v58 = vadd.f32 %v2953_v10, %v5201_v17  ;;  %v2857_v35 = vpop.permute.xlu0 %2856 }
 0x3df   :  { %v2954_v26 = vmul.f32 %v2922_v22, %v2857_v35 }
 0x3e0   :  { %3017 = vst [vmem:[#allocation10 + $0xe8] sm:$0xff] %v2985_v58 }
 0x3e1   :  { %v2986_v23 = vadd.f32 %v2954_v26, %v5210_v16 }
 0x3e2   :  { %v2859_v20 = vpop.permute.xlu1 %2858 }
 0x3e3   :  { %3018 = vst [vmem:[#allocation10 + $0xf0] sm:$0xff] %v2986_v23  ;;  %v2955_v36 = vmul.f32 %v2923_v19, %v2859_v20 }
 0x3e5   :  { %v2987_v1 = vadd.f32 %v2955_v36, %v5218_v31 }
 0x3e7   :  { %3019 = vst [vmem:[#allocation10 + $0xf8] sm:$0xff] %v2987_v1 }
 0x3e8   :  { %4095 = shalt.err (!%p4092_p8)
}
 0x3e9   :  { %s4096_s11 = scalar_lea.hbm %s5271_s6, 4096 }
 0x3ea   :  { %p4097_p9 = scmp.ne.s32.totalorder %s5271_s6, %s4096_s11  ;;  %p4100_p10 = scmp.lt.u32.totalorder %s4096_s11, %s5271_s6 }
 0x3ec   :  { %p4102_p11 = pnand %p4100_p10, %p4097_p9 }
 0x3ee   :  { %4105 = shalt.err (!%p4102_p11)
}
 0x3ef   :  { %3031 = dma.vmem_to_hbm [thread:$0]  %s3026_s29, 4096, %s5271_s6, [#allocation4], %s4115_s7, %s4115_s7, %s4116_s8  }
 0x3f0   :  { %4112 = dma.done.wait [#allocation4], 4096  }
 0x3f1   :  { %4113 = vsyncadd [#allocation4], 4294963200 }
 0x3f2   :  { %3035 = vsyncpa [#allocation3], 1 }
 0x3f3   :  { %3036 = vsyncpa [#allocation6], 1 }
 0x3f4   :  { %3037 = vsyncpa [#allocation9], 1 }
 0x3f5   :  { %3038 = vsyncpa [#allocation4], 1 }

</bundles_post_ra>
